<compile_context>
chip_gen: v5e
topology: v5e:2x2
jax: 0.10.0
libtpu: 0.0.40
codegen_flags: <defaults>
</compile_context>

<pallas_src>
import numpy as np
import jax
import jax.numpy as jnp
from jax import lax
from jax.experimental import pallas as pl
from jax.experimental.pallas import tpu as pltpu

# ---------------- small, module-consistent configuration ---------------------
DIM        = 16
NUM_HEADS  = 4
HEAD_DIM   = DIM // NUM_HEADS
RESOLUTION = 8
IDX        = -1            # -1: full-resolution window (H_sp = W_sp = resolution)
SPLIT_SIZE = 4
AGENT_NUM  = 16
POOL_SIZE  = int(AGENT_NUM ** 0.5)
SCALE      = HEAD_DIM ** -0.5
B          = 2

if IDX == -1:
    H_SP, W_SP = RESOLUTION, RESOLUTION
elif IDX == 0:
    H_SP, W_SP = RESOLUTION, SPLIT_SIZE
else:
    W_SP, H_SP = RESOLUTION, SPLIT_SIZE

N_WIN = H_SP * W_SP                  # tokens per window (64)
A_ALL = NUM_HEADS * AGENT_NUM        # fused (head, agent) axis (64)


# ---------------- Pallas kernel ----------------------------------------------
def agent_attn_kernel(q_ref, k_ref, v_ref, lepe_ref, pool_ref, hmask_ref,
                      maskt_ref, pb_ref, ab_ref, o_ref):
    """Fused-head agent attention for a block of `wb` windows.

    q/k:   (wb, n, C)        bf16 window tokens (channel-last)
    v:     (wb, C, n)        f32 window values, channel-first
    lepe:  (C, wb*n)         f32 LePE, flattened lane-dense (matches output)
    pool:  (A_ALL, n)        bf16 pooling matrix, SCALE folded in, tiled over heads
    hmask: (A_ALL, C)        1 where row-head == column-head
    maskt: (C, A_ALL)        hmask transposed
    pb:    (A_ALL, n)        position bias (agents -> keys)
    ab:    (n, A_ALL)        agent bias (queries -> agents)
    out:   (C, wb*n)         f32, channel-first, lane-dense (wb even => %128 == 0)
    """
    f32 = jnp.float32
    q      = q_ref[...]
    k      = k_ref[...]
    v_t    = v_ref[...]
    pool   = pool_ref[...]
    hmask  = hmask_ref[...]
    mask_t = maskt_ref[...]
    pb     = pb_ref[...]
    ab     = ab_ref[...]
    wb = q.shape[0]

    # ---- agent tokens (AdaptiveAvgPool as a matmul), block-diagonal over heads
    agent = jnp.einsum('an,wnc->wac', pool, q, preferred_element_type=f32)
    agent_bd = (agent * hmask[None]).astype(jnp.bfloat16)            # (wb, A, C)

    # ---- stage 1: agents attend over keys (exact row softmax over n) --------
    s1 = jnp.einsum('wac,wnc->wan', agent_bd, k,
                    preferred_element_type=f32) + pb[None]
    e1 = jnp.exp(s1 - jnp.max(s1, axis=-1, keepdims=True))
    # denominator >= 1 (max term is 1) -> approx reciprocal (EUP slot) is safe.
    p1 = e1 * pl.reciprocal(jnp.sum(e1, axis=-1, keepdims=True), approx=True)
    # channel-first agent values; zero cross-head channels
    agent_v_t = jnp.einsum('wcn,wan->wca', v_t, p1,
                           preferred_element_type=f32) * mask_t[None]  # (wb, C, A)

    # ---- stage 2: queries attend over the 16 agents of their own head -------
    s2 = jnp.einsum('wnc,wac->wna', q, agent_bd,
                    preferred_element_type=f32) + ab[None]
    # Global row max is a valid stabilizer; the per-head normalization below
    # (den) makes the result an exact per-head softmax.  Logits here are O(1)
    # (scale folded, biases ~0.02) so no head can underflow.
    e2 = jnp.exp(s2 - jnp.max(s2, axis=-1, keepdims=True))
    # One matmul produces numerator (first C rows) and per-head denominator
    # (mask rows appended below) in natural (w, rows, n) order — no transposes.
    av_aug = jnp.concatenate(
        [agent_v_t, jnp.broadcast_to(mask_t, (wb,) + mask_t.shape)], axis=1)
    nd = jnp.einsum('wka,wna->wkn', av_aug, e2,
                    preferred_element_type=f32)                        # (wb, 2C, n)
    num_t = nd[:, :DIM, :]
    den_t = jnp.maximum(nd[:, DIM:, :], jnp.float32(1e-30))  # guard degenerate 0/0
    x_t = num_t / den_t                                      # exact divide (review)

    # ---- single lane-dense store: (C, wb*n), wb even => multiple of 128 lanes
    x_flat = jnp.concatenate([x_t[w] for w in range(wb)], axis=-1)
    o_ref[...] = (x_flat + lepe_ref[...]).astype(o_ref.dtype)


def _plan_grid(b):
    """Return (windows-per-step wb, grid steps).

    wb is even so the flattened output block (DIM, wb*N_WIN) is a multiple of
    128 lanes (unmasked stores, lane-dense writeback DMA).  For b >= 3 we aim
    for ~2 grid steps so both v7x TensorCores get work under
    dimension_semantics=("parallel",); per-step pipeline overhead (~0.5 us)
    rivals the compute here, so the step count stays tiny.  VMEM is never the
    constraint: at wb=32 the per-step working set is well under 1 MiB even
    double-buffered (v7x 64 MiB, v5e/v6e 128 MiB).  b == 2 stays a single step:
    a 2-way split would need either 64-lane masked output blocks (wb=1) or a
    duplicated padded window per core — neither improves wall-clock.
    Ragged/prime b is padded instead of degrading to wb=1.
    """
    wb = max(2, min(32, 2 * ((b + 3) // 4)))     # ~ceil(b/2) rounded up to even
    steps = -(-b // wb)
    return wb, steps


def agent_attention_pallas(q_w, k_w, v_t, lepe_flat, pool_bd, hmask, mask_t,
                           pb, ab, *, wb, steps):
    b_pad = q_w.shape[0]
    assert b_pad == wb * steps and wb % 2 == 0
    win_qk = pl.BlockSpec((wb, N_WIN, DIM), lambda i: (i, 0, 0))
    win_cn = pl.BlockSpec((wb, DIM, N_WIN), lambda i: (i, 0, 0))
    flat   = pl.BlockSpec((DIM, wb * N_WIN), lambda i: (0, i))
    return pl.pallas_call(
        agent_attn_kernel,
        out_shape=jax.ShapeDtypeStruct((DIM, b_pad * N_WIN), jnp.float32),
        grid=(steps,),
        in_specs=[
            win_qk,                                            # q  (bf16)
            win_qk,                                            # k  (bf16)
            win_cn,                                            # v, channel-first (f32)
            flat,                                              # lepe, lane-dense (f32)
            pl.BlockSpec((A_ALL, N_WIN), lambda i: (0, 0)),    # pooling matrix (bf16)
            pl.BlockSpec((A_ALL, DIM),   lambda i: (0, 0)),    # head mask
            pl.BlockSpec((DIM, A_ALL),   lambda i: (0, 0)),    # head mask transposed
            pl.BlockSpec((A_ALL, N_WIN), lambda i: (0, 0)),    # position bias
            pl.BlockSpec((N_WIN, A_ALL), lambda i: (0, 0)),    # agent bias
        ],
        out_specs=flat,
        compiler_params=pltpu.CompilerParams(dimension_semantics=("parallel",)),
    )(q_w, k_w, v_t, lepe_flat, pool_bd, hmask, mask_t, pb, ab)


# ---------------- plain-JAX glue (layout / constant prep only) ----------------
def img2windows(img, H_sp, W_sp):
    Bb, C, H, W = img.shape
    x = img.reshape(Bb, C, H // H_sp, H_sp, W // W_sp, W_sp)
    x = x.transpose(0, 2, 4, 3, 5, 1).reshape(-1, H_sp * W_sp, C)
    return x


def windows2img(wins, H_sp, W_sp, H, W):
    Bb = wins.shape[0] // (H * W // (H_sp * W_sp))
    C = wins.shape[-1]
    x = wins.reshape(Bb, H // H_sp, W // W_sp, H_sp, W_sp, C)
    x = x.transpose(0, 1, 3, 2, 4, 5).reshape(Bb, H, W, C)
    return x


def windows_cfirst_to_img(x_cfirst, H_sp, W_sp, H, W):
    # (C, b, H_sp*W_sp) channel-first windows -> (B, H*W, C) in one transpose.
    C, b, n = x_cfirst.shape
    Bb = b // ((H // H_sp) * (W // W_sp))
    x = x_cfirst.reshape(C, Bb, H // H_sp, W // W_sp, H_sp, W_sp)
    x = x.transpose(1, 2, 4, 3, 5, 0).reshape(Bb, H * W, C)
    return x


def im2cswin(x, H, W, H_sp, W_sp):
    Bb, L, C = x.shape
    x = x.transpose(0, 2, 1).reshape(Bb, C, H, W)
    return img2windows(x, H_sp, W_sp)


def bilinear_resize(x, out_h, out_w):
    # matches torch F.interpolate(mode='bilinear', align_corners=False)
    in_h, in_w = x.shape[-2], x.shape[-1]

    def idx(out_n, in_n):
        i = jnp.arange(out_n, dtype=jnp.float32)
        src = (i + 0.5) * (in_n / out_n) - 0.5
        src = jnp.clip(src, 0.0, in_n - 1)
        i0 = jnp.floor(src).astype(jnp.int32)
        i1 = jnp.minimum(i0 + 1, in_n - 1)
        w = src - i0.astype(jnp.float32)
        return i0, i1, w

    h0, h1, wh = idx(out_h, in_h)
    w0, w1, ww = idx(out_w, in_w)
    top = jnp.take(x, h0, axis=-2)
    bot = jnp.take(x, h1, axis=-2)
    rows = top * (1.0 - wh)[:, None] + bot * wh[:, None]
    left = jnp.take(rows, w0, axis=-1)
    right = jnp.take(rows, w1, axis=-1)
    return left * (1.0 - ww) + right * ww


def adaptive_pool_matrix(H, W, ps):
    # AdaptiveAvgPool2d((ps, ps)) expressed as an (agent, n) matrix.
    mat = np.zeros((ps * ps, H * W), dtype=np.float32)
    for ph in range(ps):
        h0 = (ph * H) // ps
        h1 = -((-(ph + 1) * H) // ps)
        for pw in range(ps):
            w0 = (pw * W) // ps
            w1 = -((-(pw + 1) * W) // ps)
            cnt = (h1 - h0) * (w1 - w0)
            for hh in range(h0, h1):
                for wv in range(w0, w1):
                    mat[ph * ps + pw, hh * W + wv] = 1.0 / cnt
    return jnp.asarray(mat)


def make_head_mask():
    rows = np.arange(A_ALL) // AGENT_NUM
    cols = np.arange(DIM) // HEAD_DIM
    return jnp.asarray((rows[:, None] == cols[None, :]).astype(np.float32))


def prepare_biases(params):
    pb1 = bilinear_resize(params['an_bias'], H_SP, W_SP).reshape(NUM_HEADS, AGENT_NUM, N_WIN)
    pb2 = (params['ah_bias'] + params['aw_bias']).reshape(NUM_HEADS, AGENT_NUM, N_WIN)
    pos_bias = pb1 + pb2
    ab1 = bilinear_resize(params['na_bias'], H_SP, W_SP).reshape(
        NUM_HEADS, AGENT_NUM, N_WIN).transpose(0, 2, 1)
    ab2 = (params['ha_bias'] + params['wa_bias']).reshape(NUM_HEADS, N_WIN, AGENT_NUM)
    agent_bias = ab1 + ab2
    return pos_bias, agent_bias


def agent_attention_forward(qkv, params):
    q, k, v = qkv[0], qkv[1], qkv[2]
    H = W = RESOLUTION
    Bb, L, C = q.shape
    assert L == H * W

    q_w = im2cswin(q, H, W, H_SP, W_SP)        # (b, n, C)
    k_w = im2cswin(k, H, W, H_SP, W_SP)
    v_w = im2cswin(v, H, W, H_SP, W_SP)
    b = q_w.shape[0]

    # LePE: 3x3 depthwise conv on v (channel-first layout is reused by the kernel).
    v_nchw = v_w.reshape(b, H_SP, W_SP, C).transpose(0, 3, 1, 2)       # (b, C, h, w)
    lepe = lax.conv_general_dilated(
        v_nchw, params['conv_w'], window_strides=(1, 1), padding=((1, 1), (1, 1)),
        dimension_numbers=('NCHW', 'OIHW', 'NCHW'), feature_group_count=C)
    lepe_t = (lepe + params['conv_b'][None, :, None, None]).reshape(b, C, N_WIN)
    v_t = v_nchw.reshape(b, C, N_WIN)                                  # (b, C, n)

    # Constants: pooling matrix (attention scale folded in, tiled over heads),
    # head masks, flattened biases.
    pool_mat = adaptive_pool_matrix(H_SP, W_SP, POOL_SIZE)             # (agent, n)
    pool_bd = SCALE * jnp.tile(pool_mat, (NUM_HEADS, 1))               # (A_ALL, n)
    hmask = make_head_mask()                                           # (A_ALL, C)
    mask_t = hmask.T                                                   # (C, A_ALL)
    pos_bias, agent_bias = prepare_biases(params)
    pb = pos_bias.reshape(A_ALL, N_WIN)                                # (A_ALL, n)
    ab = agent_bias.transpose(1, 0, 2).reshape(N_WIN, A_ALL)           # (n, A_ALL)

    # Window batching (even wb, lane-dense output blocks, >=2 steps for v7x).
    wb, steps = _plan_grid(b)
    b_pad = wb * steps
    if b_pad != b:
        padw = ((0, b_pad - b), (0, 0), (0, 0))
        q_w, k_w = jnp.pad(q_w, padw), jnp.pad(k_w, padw)
        v_t, lepe_t = jnp.pad(v_t, padw), jnp.pad(lepe_t, padw)
    lepe_flat = lepe_t.transpose(1, 0, 2).reshape(C, b_pad * N_WIN)    # (C, b_pad*n)

    out_flat = agent_attention_pallas(
        q_w.astype(jnp.bfloat16), k_w.astype(jnp.bfloat16), v_t, lepe_flat,
        pool_bd.astype(jnp.bfloat16), hmask, mask_t, pb, ab,
        wb=wb, steps=steps)                                            # (C, b_pad*n)

    x_cfirst = out_flat.reshape(C, b_pad, N_WIN)[:, :b]                # (C, b, n)
    return windows_cfirst_to_img(x_cfirst, H_SP, W_SP, H, W)           # (Bb, H*W, C)


# ---------------- pure-JAX reference (mirrors the PyTorch forward) ------------
def agent_attention_reference(qkv, params):
    q, k, v = qkv[0], qkv[1], qkv[2]
    H = W = RESOLUTION
    Bb, L, C = q.shape
    q_w = im2cswin(q, H, W, H_SP, W_SP)
    k_w = im2cswin(k, H, W, H_SP, W_SP)
    v_w = im2cswin(v, H, W, H_SP, W_SP)
    b, n, c = q_w.shape

    v_nchw = v_w.reshape(b, H_SP, W_SP, c).transpose(0, 3, 1, 2)
    lepe = lax.conv_general_dilated(
        v_nchw, params['conv_w'], window_strides=(1, 1), padding=((1, 1), (1, 1)),
        dimension_numbers=('NCHW', 'OIHW', 'NCHW'), feature_group_count=c)
    lepe = lepe + params['conv_b'][None, :, None, None]
    lepe = lepe.reshape(b, c, n).transpose(0, 2, 1)

    pool_mat = adaptive_pool_matrix(H_SP, W_SP, POOL_SIZE)
    agent = jnp.einsum('an,bnc->bac', pool_mat, q_w)

    qh = q_w.reshape(b, n, NUM_HEADS, HEAD_DIM).transpose(0, 2, 1, 3)
    kh = k_w.reshape(b, n, NUM_HEADS, HEAD_DIM).transpose(0, 2, 1, 3)
    vh = v_w.reshape(b, n, NUM_HEADS, HEAD_DIM).transpose(0, 2, 1, 3)
    ah = agent.reshape(b, AGENT_NUM, NUM_HEADS, HEAD_DIM).transpose(0, 2, 1, 3)

    pos_bias, agent_bias = prepare_biases(params)
    agent_attn = jax.nn.softmax(
        ah * SCALE @ jnp.swapaxes(kh, -2, -1) + pos_bias[None], axis=-1)
    agent_v = agent_attn @ vh
    q_attn = jax.nn.softmax(
        qh * SCALE @ jnp.swapaxes(ah, -2, -1) + agent_bias[None], axis=-1)
    x = q_attn @ agent_v
    x = x.transpose(0, 2, 1, 3).reshape(b, n, c)
    x = x + lepe
    x = windows2img(x, H_SP, W_SP, H, W).reshape(Bb, -1, C)
    return x


# ---------------- main --------------------------------------------------------
if __name__ == "__main__":
    key = jax.random.PRNGKey(0)
    keys = jax.random.split(key, 9)
    qkv = jax.random.normal(keys[0], (3, B, RESOLUTION * RESOLUTION, DIM), dtype=jnp.float32)

    # deterministic, synthetic parameters (trunc_normal std=0.02 -> normal*0.02)
    params = {
        'conv_w': 0.1 * jax.random.normal(keys[1], (DIM, 1, 3, 3), jnp.float32),
        'conv_b': 0.1 * jax.random.normal(keys[2], (DIM,), jnp.float32),
        'an_bias': 0.02 * jax.random.normal(keys[3], (NUM_HEADS, AGENT_NUM, 7, 7), jnp.float32),
        'na_bias': 0.02 * jax.random.normal(keys[4], (NUM_HEADS, AGENT_NUM, 7, 7), jnp.float32),
        'ah_bias': 0.02 * jax.random.normal(keys[5], (1, NUM_HEADS, AGENT_NUM, H_SP, 1), jnp.float32),
        'aw_bias': 0.02 * jax.random.normal(keys[6], (1, NUM_HEADS, AGENT_NUM, 1, W_SP), jnp.float32),
        'ha_bias': 0.02 * jax.random.normal(keys[7], (1, NUM_HEADS, H_SP, 1, AGENT_NUM), jnp.float32),
        'wa_bias': 0.02 * jax.random.normal(keys[8], (1, NUM_HEADS, 1, W_SP, AGENT_NUM), jnp.float32),
    }

    out = jax.block_until_ready(jax.jit(agent_attention_forward)(qkv, params))
    ref = jax.block_until_ready(agent_attention_reference(qkv, params))

    assert out.shape == (B, RESOLUTION * RESOLUTION, DIM)
    err = float(jnp.max(jnp.abs(out - ref)))
    # Tolerance covers bf16 q/k/agent logits + the stage-1 approximate
    # reciprocal; the value path and stage-2 normalization are exact f32.
    assert err < 2e-2, f"max abs err {err}"
    print("KERNEL_OK")
</pallas_src>

<mosaic_0001>
module attributes {stable_mosaic.version = 11 : i64} {
  func.func @agent_attn_kernel(%arg0: i32, %arg1: memref<2x64x16xbf16, #tpu.memory_space<vmem>>, %arg2: memref<2x64x16xbf16, #tpu.memory_space<vmem>>, %arg3: memref<2x16x64xf32, #tpu.memory_space<vmem>>, %arg4: memref<16x128xf32, #tpu.memory_space<vmem>>, %arg5: memref<64x64xbf16, #tpu.memory_space<vmem>>, %arg6: memref<64x16xf32, #tpu.memory_space<vmem>>, %arg7: memref<16x64xf32, #tpu.memory_space<vmem>>, %arg8: memref<64x64xf32, #tpu.memory_space<vmem>>, %arg9: memref<64x64xf32, #tpu.memory_space<vmem>>, %arg10: memref<16x128xf32, #tpu.memory_space<vmem>>) attributes {dimension_semantics = [#tpu.dimension_semantics<parallel>], iteration_bounds = array<i64: 1>, scalar_prefetch = 0 : i64, scratch_operands = 0 : i64, tpu.core_type = #tpu.core_type<tc>, window_params = [{transform_indices = @transform_0, window_bounds = array<i64: 2, 64, 16>}, {transform_indices = @transform_1, window_bounds = array<i64: 2, 64, 16>}, {transform_indices = @transform_2, window_bounds = array<i64: 2, 16, 64>}, {transform_indices = @transform_3, window_bounds = array<i64: 16, 128>}, {pipeline_mode = #tpu.pipeline_mode<synchronous>, transform_indices = @transform_4, window_bounds = array<i64: 64, 64>}, {pipeline_mode = #tpu.pipeline_mode<synchronous>, transform_indices = @transform_5, window_bounds = array<i64: 64, 16>}, {pipeline_mode = #tpu.pipeline_mode<synchronous>, transform_indices = @transform_6, window_bounds = array<i64: 16, 64>}, {pipeline_mode = #tpu.pipeline_mode<synchronous>, transform_indices = @transform_7, window_bounds = array<i64: 64, 64>}, {pipeline_mode = #tpu.pipeline_mode<synchronous>, transform_indices = @transform_8, window_bounds = array<i64: 64, 64>}, {transform_indices = @transform_9, window_bounds = array<i64: 16, 128>}]} {
    %c0 = arith.constant 0 : index
    %c0_0 = arith.constant 0 : index
    %c0_1 = arith.constant 0 : index
    %0 = vector.load %arg1[%c0, %c0_0, %c0_1] : memref<2x64x16xbf16, #tpu.memory_space<vmem>>, vector<2x64x16xbf16>
    %c0_2 = arith.constant 0 : index
    %c0_3 = arith.constant 0 : index
    %c0_4 = arith.constant 0 : index
    %1 = vector.load %arg2[%c0_2, %c0_3, %c0_4] : memref<2x64x16xbf16, #tpu.memory_space<vmem>>, vector<2x64x16xbf16>
    %c0_5 = arith.constant 0 : index
    %c0_6 = arith.constant 0 : index
    %c0_7 = arith.constant 0 : index
    %2 = vector.load %arg3[%c0_5, %c0_6, %c0_7] : memref<2x16x64xf32, #tpu.memory_space<vmem>>, vector<2x16x64xf32>
    %c0_8 = arith.constant 0 : index
    %c0_9 = arith.constant 0 : index
    %3 = vector.load %arg5[%c0_8, %c0_9] : memref<64x64xbf16, #tpu.memory_space<vmem>>, vector<64x64xbf16>
    %c0_10 = arith.constant 0 : index
    %c0_11 = arith.constant 0 : index
    %4 = vector.load %arg6[%c0_10, %c0_11] : memref<64x16xf32, #tpu.memory_space<vmem>>, vector<64x16xf32>
    %c0_12 = arith.constant 0 : index
    %c0_13 = arith.constant 0 : index
    %5 = vector.load %arg7[%c0_12, %c0_13] : memref<16x64xf32, #tpu.memory_space<vmem>>, vector<16x64xf32>
    %c0_14 = arith.constant 0 : index
    %c0_15 = arith.constant 0 : index
    %6 = vector.load %arg8[%c0_14, %c0_15] : memref<64x64xf32, #tpu.memory_space<vmem>>, vector<64x64xf32>
    %c0_16 = arith.constant 0 : index
    %c0_17 = arith.constant 0 : index
    %7 = vector.load %arg9[%c0_16, %c0_17] : memref<64x64xf32, #tpu.memory_space<vmem>>, vector<64x64xf32>
    "tpu.trace_start"() <{level = 10 : i32, message = "an,wnc->wac"}> : () -> ()
    %cst = arith.constant dense<0.000000e+00> : vector<2x16x64xf32>
    %8 = tpu.matmul %0, %3, %cst {dimension_numbers = #tpu.dot_dimension_numbers<[1], [1], [0, 2], [0], [0, 0, 0, 2, 1, 0], [], []>} : vector<2x64x16xbf16>, vector<64x64xbf16>, vector<2x16x64xf32> -> vector<2x16x64xf32>
    %9 = tpu.transpose %8, [0, 2, 1] : vector<2x16x64xf32> -> vector<2x64x16xf32>
    "tpu.trace_stop"() : () -> ()
    %10 = vector.shape_cast %4 : vector<64x16xf32> to vector<1x64x16xf32>
    %11 = vector.broadcast %10 : vector<1x64x16xf32> to vector<2x64x16xf32>
    %12 = arith.mulf %9, %11 : vector<2x64x16xf32>
    %13 = arith.truncf %12 : vector<2x64x16xf32> to vector<2x64x16xbf16>
    "tpu.trace_start"() <{level = 10 : i32, message = "wac,wnc->wan"}> : () -> ()
    %cst_18 = arith.constant dense<0.000000e+00> : vector<2x64x64xf32>
    %14 = tpu.matmul %13, %1, %cst_18 {dimension_numbers = #tpu.dot_dimension_numbers<[2], [2], [1], [1], [0, 0, 0, 1, 1, 1], [0], [0]>} : vector<2x64x16xbf16>, vector<2x64x16xbf16>, vector<2x64x64xf32> -> vector<2x64x64xf32>
    "tpu.trace_stop"() : () -> ()
    %15 = vector.shape_cast %6 : vector<64x64xf32> to vector<1x64x64xf32>
    %16 = vector.broadcast %15 : vector<1x64x64xf32> to vector<2x64x64xf32>
    %17 = arith.addf %14, %16 : vector<2x64x64xf32>
    %cst_19 = arith.constant dense<0xFF800000> : vector<2x64xf32>
    %18 = vector.multi_reduction <maximumf>, %17, %cst_19 [2] : vector<2x64x64xf32> to vector<2x64xf32>
    %19 = vector.shape_cast %18 : vector<2x64xf32> to vector<2x64x1xf32>
    %20 = vector.broadcast %19 : vector<2x64x1xf32> to vector<2x64x64xf32>
    %21 = arith.subf %17, %20 : vector<2x64x64xf32>
    %22 = math.exp %21 : vector<2x64x64xf32>
    %cst_20 = arith.constant dense<0.000000e+00> : vector<2x64xf32>
    %23 = vector.multi_reduction <add>, %22, %cst_20 [2] : vector<2x64x64xf32> to vector<2x64xf32>
    %24 = vector.shape_cast %23 : vector<2x64xf32> to vector<2x64x1xf32>
    %25 = tpu.reciprocal %24 {approx = true} : vector<2x64x1xf32> -> vector<2x64x1xf32>
    %26 = vector.broadcast %25 : vector<2x64x1xf32> to vector<2x64x64xf32>
    %27 = arith.mulf %22, %26 : vector<2x64x64xf32>
    "tpu.trace_start"() <{level = 10 : i32, message = "wcn,wan->wca"}> : () -> ()
    %cst_21 = arith.constant dense<0.000000e+00> : vector<2x16x64xf32>
    %28 = tpu.matmul %2, %27, %cst_21 {dimension_numbers = #tpu.dot_dimension_numbers<[2], [2], [1], [1], [0, 0, 0, 1, 1, 1], [0], [0]>} : vector<2x16x64xf32>, vector<2x64x64xf32>, vector<2x16x64xf32> -> vector<2x16x64xf32>
    "tpu.trace_stop"() : () -> ()
    %29 = vector.shape_cast %5 : vector<16x64xf32> to vector<1x16x64xf32>
    %30 = vector.broadcast %29 : vector<1x16x64xf32> to vector<2x16x64xf32>
    %31 = arith.mulf %28, %30 : vector<2x16x64xf32>
    "tpu.trace_start"() <{level = 10 : i32, message = "wnc,wac->wna"}> : () -> ()
    %cst_22 = arith.constant dense<0.000000e+00> : vector<2x64x64xf32>
    %32 = tpu.matmul %0, %13, %cst_22 {dimension_numbers = #tpu.dot_dimension_numbers<[2], [2], [1], [1], [0, 0, 0, 1, 1, 1], [0], [0]>} : vector<2x64x16xbf16>, vector<2x64x16xbf16>, vector<2x64x64xf32> -> vector<2x64x64xf32>
    "tpu.trace_stop"() : () -> ()
    %33 = vector.shape_cast %7 : vector<64x64xf32> to vector<1x64x64xf32>
    %34 = vector.broadcast %33 : vector<1x64x64xf32> to vector<2x64x64xf32>
    %35 = arith.addf %32, %34 : vector<2x64x64xf32>
    %cst_23 = arith.constant dense<0xFF800000> : vector<2x64xf32>
    %36 = vector.multi_reduction <maximumf>, %35, %cst_23 [2] : vector<2x64x64xf32> to vector<2x64xf32>
    %37 = vector.shape_cast %36 : vector<2x64xf32> to vector<2x64x1xf32>
    %38 = vector.broadcast %37 : vector<2x64x1xf32> to vector<2x64x64xf32>
    %39 = arith.subf %35, %38 : vector<2x64x64xf32>
    %40 = math.exp %39 : vector<2x64x64xf32>
    %41 = vector.shape_cast %5 : vector<16x64xf32> to vector<1x16x64xf32>
    %42 = vector.broadcast %41 : vector<1x16x64xf32> to vector<2x16x64xf32>
    %43 = tpu.concatenate %31, %42 in 1 : vector<2x16x64xf32>, vector<2x16x64xf32> -> vector<2x32x64xf32>
    "tpu.trace_start"() <{level = 10 : i32, message = "wka,wna->wkn"}> : () -> ()
    %cst_24 = arith.constant dense<0.000000e+00> : vector<2x32x64xf32>
    %44 = tpu.matmul %43, %40, %cst_24 {dimension_numbers = #tpu.dot_dimension_numbers<[2], [2], [1], [1], [0, 0, 0, 1, 1, 1], [0], [0]>} : vector<2x32x64xf32>, vector<2x64x64xf32>, vector<2x32x64xf32> -> vector<2x32x64xf32>
    "tpu.trace_stop"() : () -> ()
    %45 = vector.extract_strided_slice %44 {offsets = [0, 0, 0], sizes = [2, 16, 64], strides = [1, 1, 1]} : vector<2x32x64xf32> to vector<2x16x64xf32>
    %46 = vector.extract_strided_slice %44 {offsets = [0, 16, 0], sizes = [2, 16, 64], strides = [1, 1, 1]} : vector<2x32x64xf32> to vector<2x16x64xf32>
    %cst_25 = arith.constant 1.000000e-30 : f32
    %47 = vector.broadcast %cst_25 : f32 to vector<2x16x64xf32>
    %48 = arith.maximumf %46, %47 : vector<2x16x64xf32>
    %49 = arith.divf %45, %48 : vector<2x16x64xf32>
    %50 = vector.extract_strided_slice %49 {offsets = [0, 0, 0], sizes = [1, 16, 64], strides = [1, 1, 1]} : vector<2x16x64xf32> to vector<1x16x64xf32>
    %51 = vector.shape_cast %50 : vector<1x16x64xf32> to vector<16x64xf32>
    %52 = vector.extract_strided_slice %49 {offsets = [1, 0, 0], sizes = [1, 16, 64], strides = [1, 1, 1]} : vector<2x16x64xf32> to vector<1x16x64xf32>
    %53 = vector.shape_cast %52 : vector<1x16x64xf32> to vector<16x64xf32>
    %54 = tpu.concatenate %51, %53 in 1 : vector<16x64xf32>, vector<16x64xf32> -> vector<16x128xf32>
    %c0_26 = arith.constant 0 : index
    %c0_27 = arith.constant 0 : index
    %55 = vector.load %arg4[%c0_26, %c0_27] : memref<16x128xf32, #tpu.memory_space<vmem>>, vector<16x128xf32>
    %56 = arith.addf %54, %55 : vector<16x128xf32>
    %c0_28 = arith.constant 0 : index
    %c0_29 = arith.constant 0 : index
    %57 = vector.load %arg10[%c0_28, %c0_29] : memref<16x128xf32, #tpu.memory_space<vmem>>, vector<16x128xf32>
    tpu.vector_store %arg10[%c0_28, %c0_29], %56 {strides = array<i32>} : memref<16x128xf32, #tpu.memory_space<vmem>>, vector<16x128xf32>,
    return
  }
  func.func @transform_0(%arg0: i32) -> (i32, i32, i32) {
    %c0_i32 = arith.constant 0 : i32
    %c0_i32_0 = arith.constant 0 : i32
    %c0_i32_1 = arith.constant 0 : i32
    return %arg0, %c0_i32, %c0_i32_0 : i32, i32, i32
  }
  func.func @transform_1(%arg0: i32) -> (i32, i32, i32) {
    %c0_i32 = arith.constant 0 : i32
    %c0_i32_0 = arith.constant 0 : i32
    %c0_i32_1 = arith.constant 0 : i32
    return %arg0, %c0_i32, %c0_i32_0 : i32, i32, i32
  }
  func.func @transform_2(%arg0: i32) -> (i32, i32, i32) {
    %c0_i32 = arith.constant 0 : i32
    %c0_i32_0 = arith.constant 0 : i32
    %c0_i32_1 = arith.constant 0 : i32
    return %arg0, %c0_i32, %c0_i32_0 : i32, i32, i32
  }
  func.func @transform_3(%arg0: i32) -> (i32, i32) {
    %c0_i32 = arith.constant 0 : i32
    %c0_i32_0 = arith.constant 0 : i32
    return %c0_i32, %arg0 : i32, i32
  }
  func.func @transform_4(%arg0: i32) -> (i32, i32) {
    %c0_i32 = arith.constant 0 : i32
    %c0_i32_0 = arith.constant 0 : i32
    %c0_i32_1 = arith.constant 0 : i32
    return %c0_i32, %c0_i32_0 : i32, i32
  }
  func.func @transform_5(%arg0: i32) -> (i32, i32) {
    %c0_i32 = arith.constant 0 : i32
    %c0_i32_0 = arith.constant 0 : i32
    %c0_i32_1 = arith.constant 0 : i32
    return %c0_i32, %c0_i32_0 : i32, i32
  }
  func.func @transform_6(%arg0: i32) -> (i32, i32) {
    %c0_i32 = arith.constant 0 : i32
    %c0_i32_0 = arith.constant 0 : i32
    %c0_i32_1 = arith.constant 0 : i32
    return %c0_i32, %c0_i32_0 : i32, i32
  }
  func.func @transform_7(%arg0: i32) -> (i32, i32) {
    %c0_i32 = arith.constant 0 : i32
    %c0_i32_0 = arith.constant 0 : i32
    %c0_i32_1 = arith.constant 0 : i32
    return %c0_i32, %c0_i32_0 : i32, i32
  }
  func.func @transform_8(%arg0: i32) -> (i32, i32) {
    %c0_i32 = arith.constant 0 : i32
    %c0_i32_0 = arith.constant 0 : i32
    %c0_i32_1 = arith.constant 0 : i32
    return %c0_i32, %c0_i32_0 : i32, i32
  }
  func.func @transform_9(%arg0: i32) -> (i32, i32) {
    %c0_i32 = arith.constant 0 : i32
    %c0_i32_0 = arith.constant 0 : i32
    return %c0_i32, %arg0 : i32, i32
  }
}

</mosaic_0001>

<bundles_post_ra>
// kernel: agent_attention_forward.1
= control target key start
LH: loop header
LB: loop body
LE: loop exit
PB: predicated region body
PF: predicated region fallthrough
CT: control target
= control target key end

     0   :  { %vm203_vm0 = vcmask 523264   ;;  %vm377_vm1 = vcmask 130048   ;;  %s2054_s0 = inlined_call_operand.vmem [shape: bf16[2,64,16], index: 0, kind: input, shape index: {}]   ;;  %s2055_s4 = inlined_call_operand.vmem [shape: bf16[64,64], index: 4, kind: input, shape index: {}]   ;;  %s2056_s1 = inlined_call_operand.vmem [shape: bf16[2,64,16], index: 1, kind: input, shape index: {}]   ;;  %s2057_s5 = inlined_call_operand.vmem [shape: f32[64,16], index: 5, kind: input, shape index: {}]   ;;  %s2058_s7 = inlined_call_operand.vmem [shape: f32[64,64], index: 7, kind: input, shape index: {}]   ;;  %s2059_s2 = inlined_call_operand.vmem [shape: f32[2,16,64], index: 2, kind: input, shape index: {}]   ;;  %s2060_s8 = inlined_call_operand.vmem [shape: f32[64,64], index: 8, kind: input, shape index: {}]   ;;  %s2061_s6 = inlined_call_operand.vmem [shape: f32[16,64], index: 6, kind: input, shape index: {}]   ;;  %s2062_s3 = inlined_call_operand.vmem [shape: f32[16,128], index: 3, kind: input, shape index: {}]   ;;  %s2063_s9 = inlined_call_operand.vmem [shape: f32[16,128], index: 9, kind: output, shape index: {}]  }
   0x1   :  { %v1525_v0 = vld [vmem:[%s2054_s0] sm:$0xff]  ;;  %v1537_v2 = vld [vmem:[%s2054_s0 + $0x8] sm:$0xff]  ;;  %v1357_v4 = vld [vmem:[%s2055_s4 + $0x18] sm:$0xff] }
   0x2   :  { %v1530_v1 = vld [vmem:[%s2054_s0 + $0x20] sm:$0xff]  ;;  %v1542_v3 = vld [vmem:[%s2054_s0 + $0x28] sm:$0xff]  ;;  %v220_v5 = vsel %vm203_vm0, %v1357_v4, 0  ;;  %v1356_v6 = vld [vmem:[%s2055_s4 + $0x10] sm:$0xff] }
   0x3   :  { %1361 = vxpose.binary.xlu0.c.b16.start [1/8] (short) (narrow) %v1530_v1, %v1525_v0, 16  ;;  %v217_v7 = vsel %vm203_vm0, %v1356_v6, 0  ;;  %v1557_v8 = vld [vmem:[%s2054_s0 + $0x10] sm:$0xff]  ;;  %v1355_v10 = vld [vmem:[%s2055_s4 + $0x8] sm:$0xff]  ;;  %v1354_v12 = vld [vmem:[%s2055_s4] sm:$0xff] }
   0x4   :  { %226 = vmatpush.bf16.xpose.msra.mxu0 %v220_v5  ;;  %v1562_v9 = vld [vmem:[%s2054_s0 + $0x30] sm:$0xff]  ;;  %v214_v11 = vsel %vm203_vm0, %v1355_v10, 0  ;;  %v211_v13 = vsel %vm203_vm0, %v1354_v12, 0  ;;  %v1577_v14 = vld [vmem:[%s2054_s0 + $0x18] sm:$0xff]  ;;  %v1351_v30 = vld [vmem:[%s2056_s1 + $0x28] sm:$0xff] }
   0x5   :  { %v1582_v15 = vld [vmem:[%s2054_s0 + $0x38] sm:$0xff]  ;;  %v1352_v22 = vld [vmem:[%s2056_s1 + $0x30] sm:$0xff]  ;;  %v487_v31 = vsel %vm377_vm1, %v1351_v30, 0  ;;  %v1347_v33 = vld [vmem:[%s2056_s1 + $0x8] sm:$0xff] }
   0x6   :  { %v1353_v18 = vld [vmem:[%s2056_s1 + $0x38] sm:$0xff]  ;;  %v1348_v23 = vld [vmem:[%s2056_s1 + $0x10] sm:$0xff]  ;;  %v490_v25 = vsel %vm377_vm1, %v1352_v22, 0  ;;  %v394_v34 = vsel %vm377_vm1, %v1347_v33, 0  ;;  %v1350_v35 = vld [vmem:[%s2056_s1 + $0x20] sm:$0xff] }
   0x7   :  { %v1349_v19 = vld [vmem:[%s2056_s1 + $0x18] sm:$0xff]  ;;  %v493_v20 = vsel %vm377_vm1, %v1353_v18, 0  ;;  %v397_v26 = vsel %vm377_vm1, %v1348_v23, 0  ;;  %v77_v36 = vld [vmem:[%s2057_s5] sm:$0xff]  ;;  %v484_v38 = vsel %vm377_vm1, %v1350_v35, 0  ;;  %v78_v41 = vld [vmem:[%s2057_s5 + $0x8] sm:$0xff] }
   0x8   :  { %v400_v21 = vsel %vm377_vm1, %v1349_v19, 0  ;;  %499 = vmatpush.bf16.xpose.msra.mxu2 %v493_v20  ;;  %v1346_v40 = vld [vmem:[%s2056_s1] sm:$0xff]  ;;  %v79_v50 = vld [vmem:[%s2057_s5 + $0x10] sm:$0xff]  ;;  %v80_v53 = vld [vmem:[%s2057_s5 + $0x18] sm:$0xff] }
   0x9   :  { %406 = vmatpush.bf16.xpose.msra.mxu1 %v400_v21  ;;  %v391_v44 = vsel %vm377_vm1, %v1346_v40, 0  ;;  %v81_v4 = vld [vmem:[%s2057_s5 + $0x20] sm:$0xff] }
   0xc   :  { %227 = vmatpush.bf16.xpose.msra.mxu0 %v217_v7 }
  0x10   :  { %500 = vmatpush.bf16.xpose.msra.mxu2 %v490_v25 }
  0x11   :  { %407 = vmatpush.bf16.xpose.msra.mxu1 %v397_v26 }
  0x13   :  { %1362 = vxpose.binary.xlu0.c.b16.cont [2/8] (short) (narrow) %v1542_v3, %v1537_v2, 16 }
  0x14   :  { %228 = vmatpush.bf16.xpose.msra.mxu0 %v214_v11 }
  0x18   :  { %501 = vmatpush.bf16.xpose.msra.mxu2 %v487_v31 }
  0x19   :  { %408 = vmatpush.bf16.xpose.msra.mxu1 %v394_v34 }
  0x1c   :  { %229 = vmatpush.bf16.xpose.msra.mxu0 %v211_v13 }
  0x20   :  { %502 = vmatpush.bf16.xpose.msra.mxu2 %v484_v38 }
  0x21   :  { %409 = vmatpush.bf16.xpose.msra.mxu1 %v391_v44 }
  0x23   :  { %1363 = vxpose.binary.xlu0.c.b16.cont [3/8] (short) (narrow) %v1562_v9, %v1557_v8, 16 }
  0x33   :  { %1364 = vxpose.binary.xlu0.c.b16.end [4/8] (short) (narrow) %v1582_v15, %v1577_v14, 16 }
  0xaf   :  { %v1365_v16 = vpop.trf.xlu0 }
  0xb0   :  { %1244 = vmatmul.msk.bf16.vlgmr.msra.gmra.mxu0 %vm203_vm0, %v1365_v16  ;;  %v82_v16 = vld [vmem:[%s2057_s5 + $0x28] sm:$0xff] }
  0xb7   :  { %v1366_v17 = vpop.trf.xlu0 }
  0xc0   :  { %1245 = vmatmul.msk.bf16.gmra.mxu0 %vm203_vm0, %v1366_v17 }
 0x12d   :  { %v231_v24 = vpop.f32.mrf.mxu0 }
 0x12e   :  { %241 = vxpose.xlu2.b32.start [1/2] (short) (narrow) %v231_v24, 64 }
 0x135   :  { %v233_v27 = vpop.f32.mrf.mxu0 }
 0x136   :  { %242 = vxpose.xlu2.b32.end [2/2] (short) (narrow) %v233_v27, 64 }
 0x13d   :  { %v236_v28 = vpop.f32.mrf.mxu0 }
 0x13e   :  { %273 = vxpose.xlu1.b32.start [1/2] (short) (narrow) %v236_v28, 64  ;;  %v83_v28 = vld [vmem:[%s2057_s5 + $0x30] sm:$0xff] }
 0x145   :  { %v238_v29 = vpop.f32.mrf.mxu0 }
 0x146   :  { %274 = vxpose.xlu1.b32.end [2/2] (short) (narrow) %v238_v29, 64 }
 0x1c7   :  { %v257_v32 = vpop.trf.xlu2 }
 0x1c8   :  { %v305_v37 = vmul.f32 %v257_v32, %v77_v36 }
 0x1ca   :  { %v321_v39 = vpack.c.bf16 %v305_v37, %v305_v37 }
 0x1cc   :  { %v345_v45 = vunpack.c.l.b16 %v321_v39 }
 0x1cf   :  { %v258_v42 = vpop.trf.xlu2 }
 0x1d0   :  { %v306_v43 = vmul.f32 %v258_v42, %v78_v41 }
 0x1d2   :  { %v322_v46 = vpack.c.bf16 %v306_v43, %v306_v43 }
 0x1d4   :  { %v346_v47 = vunpack.c.l.b16 %v322_v46 }
 0x1d6   :  { %v1626_v48 = vpack.c.b16 %v346_v47, %v345_v45 }
 0x1d7   :  { %v259_v49 = vpop.trf.xlu2 }
 0x1d8   :  { %1262 = vmatmul.msk.bf16.vlgmr.msra.gmra.mxu1 %vm377_vm1, %v1626_v48  ;;  %v307_v51 = vmul.f32 %v259_v49, %v79_v50 }
 0x1da   :  { %v323_v52 = vpack.c.bf16 %v307_v51, %v307_v51 }
 0x1dc   :  { %v347_v57 = vunpack.c.l.b16 %v323_v52 }
 0x1df   :  { %v260_v54 = vpop.trf.xlu2 }
 0x1e0   :  { %v308_v55 = vmul.f32 %v260_v54, %v80_v53 }
 0x1e2   :  { %v289_v56 = vpop.trf.xlu1  ;;  %v324_v58 = vpack.c.bf16 %v308_v55, %v308_v55 }
 0x1e3   :  { %v313_v60 = vmul.f32 %v289_v56, %v77_v36  ;;  %v84_v36 = vld [vmem:[%s2057_s5 + $0x38] sm:$0xff] }
 0x1e4   :  { %v348_v59 = vunpack.c.l.b16 %v324_v58 }
 0x1e5   :  { %v329_v5 = vpack.c.bf16 %v313_v60, %v313_v60 }
 0x1e6   :  { %v1636_v61 = vpack.c.b16 %v348_v59, %v347_v57 }
 0x1e7   :  { %v261_v62 = vpop.trf.xlu2  ;;  %v439_v11 = vunpack.c.l.b16 %v329_v5 }
 0x1e8   :  { %1263 = vmatmul.msk.bf16.gmra.mxu1 %vm377_vm1, %v1636_v61  ;;  %v309_v7 = vmul.f32 %v261_v62, %v81_v4 }
 0x1ea   :  { %v290_v63 = vpop.trf.xlu1  ;;  %v325_v13 = vpack.c.bf16 %v309_v7, %v309_v7  ;;  %v88_v7 = vld [vmem:[%s2058_s7 + $0x8] sm:$0xff] }
 0x1eb   :  { %v314_v6 = vmul.f32 %v290_v63, %v78_v41 }
 0x1ec   :  { %v349_v21 = vunpack.c.l.b16 %v325_v13 }
 0x1ed   :  { %v330_v10 = vpack.c.bf16 %v314_v6, %v314_v6 }
 0x1ef   :  { %v440_v12 = vunpack.c.l.b16 %v330_v10  ;;  %v262_v17 = vpop.trf.xlu2 }
 0x1f0   :  { %v310_v19 = vmul.f32 %v262_v17, %v82_v16 }
 0x1f1   :  { %v1646_v18 = vpack.c.b16 %v440_v12, %v439_v11  ;;  %v89_v12 = vld [vmem:[%s2058_s7 + $0x10] sm:$0xff] }
 0x1f2   :  { %v291_v20 = vpop.trf.xlu1  ;;  %v326_v22 = vpack.c.bf16 %v310_v19, %v310_v19 }
 0x1f3   :  { %1282 = vmatmul.msk.bf16.vlgmr.msra.gmra.mxu2 %vm377_vm1, %v1646_v18  ;;  %v315_v24 = vmul.f32 %v291_v20, %v79_v50 }
 0x1f4   :  { %v350_v23 = vunpack.c.l.b16 %v326_v22 }
 0x1f5   :  { %v331_v29 = vpack.c.bf16 %v315_v24, %v315_v24 }
 0x1f6   :  { %v1650_v25 = vpack.c.b16 %v350_v23, %v349_v21 }
 0x1f7   :  { %v263_v26 = vpop.trf.xlu2  ;;  %v441_v33 = vunpack.c.l.b16 %v331_v29 }
 0x1f8   :  { %1264 = vmatmul.msk.bf16.gmra.mxu1 %vm377_vm1, %v1650_v25  ;;  %v311_v31 = vmul.f32 %v263_v26, %v83_v28 }
 0x1fa   :  { %v292_v27 = vpop.trf.xlu1  ;;  %v327_v35 = vpack.c.bf16 %v311_v31, %v311_v31 }
 0x1fb   :  { %v316_v30 = vmul.f32 %v292_v27, %v80_v53  ;;  %v92_v27 = vld [vmem:[%s2058_s7 + $0x28] sm:$0xff] }
 0x1fc   :  { %v351_v41 = vunpack.c.l.b16 %v327_v35 }
 0x1fd   :  { %v332_v32 = vpack.c.bf16 %v316_v30, %v316_v30 }
 0x1ff   :  { %v442_v34 = vunpack.c.l.b16 %v332_v32  ;;  %v264_v37 = vpop.trf.xlu2  ;;  %v93_v32 = vld [vmem:[%s2058_s7 + $0x30] sm:$0xff] }
 0x200   :  { %v312_v39 = vmul.f32 %v264_v37, %v84_v36 }
 0x201   :  { %v1660_v38 = vpack.c.b16 %v442_v34, %v441_v33 }
 0x202   :  { %v293_v40 = vpop.trf.xlu1  ;;  %v328_v42 = vpack.c.bf16 %v312_v39, %v312_v39  ;;  %v94_v39 = vld [vmem:[%s2058_s7 + $0x38] sm:$0xff] }
 0x203   :  { %1283 = vmatmul.msk.bf16.gmra.mxu2 %vm377_vm1, %v1660_v38  ;;  %v317_v44 = vmul.f32 %v293_v40, %v81_v4  ;;  %v87_v4 = vld [vmem:[%s2058_s7] sm:$0xff] }
 0x204   :  { %v352_v43 = vunpack.c.l.b16 %v328_v42 }
 0x205   :  { %v333_v47 = vpack.c.bf16 %v317_v44, %v317_v44 }
 0x206   :  { %v1664_v45 = vpack.c.b16 %v352_v43, %v351_v41 }
 0x207   :  { %v443_v51 = vunpack.c.l.b16 %v333_v47 }
 0x208   :  { %1265 = vmatmul.msk.bf16.gmra.mxu1 %vm377_vm1, %v1664_v45 }
 0x20a   :  { %v294_v46 = vpop.trf.xlu1 }
 0x20b   :  { %v318_v49 = vmul.f32 %v294_v46, %v82_v16 }
 0x20d   :  { %v334_v50 = vpack.c.bf16 %v318_v49, %v318_v49 }
 0x20f   :  { %v444_v52 = vunpack.c.l.b16 %v334_v50  ;;  %v91_v50 = vld [vmem:[%s2058_s7 + $0x20] sm:$0xff] }
 0x211   :  { %v1668_v53 = vpack.c.b16 %v444_v52, %v443_v51 }
 0x212   :  { %v295_v54 = vpop.trf.xlu1 }
 0x213   :  { %1284 = vmatmul.msk.bf16.gmra.mxu2 %vm377_vm1, %v1668_v53  ;;  %v319_v55 = vmul.f32 %v295_v54, %v83_v28 }
 0x215   :  { %v335_v57 = vpack.c.bf16 %v319_v55, %v319_v55 }
 0x217   :  { %v445_v60 = vunpack.c.l.b16 %v335_v57 }
 0x21a   :  { %v296_v56 = vpop.trf.xlu1 }
 0x21b   :  { %v320_v58 = vmul.f32 %v296_v56, %v84_v36 }
 0x21d   :  { %v336_v59 = vpack.c.bf16 %v320_v58, %v320_v58  ;;  %v90_v58 = vld [vmem:[%s2058_s7 + $0x18] sm:$0xff] }
 0x21f   :  { %v446_v62 = vunpack.c.l.b16 %v336_v59 }
 0x221   :  { %v1672_v63 = vpack.c.b16 %v446_v62, %v445_v60 }
 0x223   :  { %1285 = vmatmul.msk.bf16.gmra.mxu2 %vm377_vm1, %v1672_v63 }
 0x255   :  { %v411_v5 = vpop.f32.mrf.mxu1 }
 0x256   :  { %v1679_v6 = vadd.f32 %v411_v5, %v87_v4 }
 0x25d   :  { %v413_v10 = vpop.f32.mrf.mxu1 }
 0x25e   :  { %v1684_v11 = vadd.f32 %v413_v10, %v88_v7 }
 0x265   :  { %v416_v13 = vpop.f32.mrf.mxu1 }
 0x266   :  { %v1689_v16 = vadd.f32 %v416_v13, %v89_v12 }
 0x26d   :  { %v418_v20 = vpop.f32.mrf.mxu1 }
 0x26e   :  { %v1730_v59 = vadd.f32 %v418_v20, %v90_v58 }
 0x270   :  { %v533_v62 = vsel %vm203_vm0, %v1730_v59, -inf }
 0x275   :  { %v421_v22 = vpop.f32.mrf.mxu1 }
 0x276   :  { %v504_v17 = vpop.f32.mrf.mxu2  ;;  %v1720_v52 = vadd.f32 %v421_v22, %v91_v50 }
 0x277   :  { %v1708_v42 = vadd.f32 %v504_v17, %v87_v4 }
 0x278   :  { %v536_v56 = vsel %vm203_vm0, %v1720_v52, -inf }
 0x279   :  { %v548_v47 = vsel %vm203_vm0, %v1708_v42, -inf }
 0x27d   :  { %v423_v24 = vpop.f32.mrf.mxu1 }
 0x27e   :  { %v506_v19 = vpop.f32.mrf.mxu2  ;;  %v1718_v51 = vadd.f32 %v423_v24, %v92_v27 }
 0x27f   :  { %v507_v5 = vadd.f32 %v506_v19, %v88_v7 }
 0x280   :  { %v539_v55 = vsel %vm203_vm0, %v1718_v51, -inf }
 0x281   :  { %v551_v10 = vsel %vm203_vm0, %v507_v5, -inf }
 0x285   :  { %v426_v30 = vpop.f32.mrf.mxu1 }
 0x286   :  { %v509_v21 = vpop.f32.mrf.mxu2 }
 0x287   :  { %v1698_v33 = vadd.f32 %v509_v21, %v89_v12  ;;  %v1736_v12 = vadd.f32 %v426_v30, %v93_v32 }
 0x289   :  { %v554_v36 = vsel %vm203_vm0, %v1698_v33, -inf  ;;  %v542_v13 = vsel %vm203_vm0, %v1736_v12, -inf }
 0x28d   :  { %v428_v40 = vpop.f32.mrf.mxu1 }
 0x28e   :  { %v511_v23 = vpop.f32.mrf.mxu2  ;;  %v1706_v41 = vadd.f32 %v428_v40, %v94_v39  ;;  %v527_v40 = vsel %vm203_vm0, %v1684_v11, -inf }
 0x28f   :  { %v512_v60 = vadd.f32 %v511_v23, %v90_v58 }
 0x290   :  { %v545_v46 = vsel %vm203_vm0, %v1706_v41, -inf }
 0x291   :  { %v557_v4 = vsel %vm203_vm0, %v512_v60, -inf }
 0x296   :  { %v514_v26 = vpop.f32.mrf.mxu2 }
 0x297   :  { %v515_v54 = vadd.f32 %v514_v26, %v91_v50 }
 0x299   :  { %v560_v57 = vsel %vm203_vm0, %v515_v54, -inf }
 0x29e   :  { %v516_v28 = vpop.f32.mrf.mxu2 }
 0x29f   :  { %v517_v29 = vadd.f32 %v516_v28, %v92_v27 }
 0x2a1   :  { %v563_v31 = vsel %vm203_vm0, %v517_v29, -inf }
 0x2a2   :  { %564 = vmax.xlane.f32.xlu0 %v563_v31 }
 0x2a6   :  { %v519_v34 = vpop.f32.mrf.mxu2 }
 0x2a7   :  { %v520_v35 = vadd.f32 %v519_v34, %v93_v32 }
 0x2a9   :  { %v566_v37 = vsel %vm203_vm0, %v520_v35, -inf }
 0x2aa   :  { %555 = vmax.xlane.f32.xlu0 %v554_v36  ;;  %567 = vmax.xlane.f32.xlu2 %v566_v37 }
 0x2ae   :  { %v521_v43 = vpop.f32.mrf.mxu2 }
 0x2af   :  { %v522_v44 = vadd.f32 %v521_v43, %v94_v39 }
 0x2b1   :  { %v569_v49 = vsel %vm203_vm0, %v522_v44, -inf }
 0x2b2   :  { %549 = vmax.xlane.f32.xlu0 %v548_v47  ;;  %570 = vmax.xlane.f32.xlu1 %v569_v49 }
 0x2b3   :  { %546 = vmax.xlane.f32.xlu2 %v545_v46 }
 0x2ba   :  { %540 = vmax.xlane.f32.xlu0 %v539_v55  ;;  %561 = vmax.xlane.f32.xlu1 %v560_v57 }
 0x2bb   :  { %537 = vmax.xlane.f32.xlu2 %v536_v56 }
 0x2c2   :  { %534 = vmax.xlane.f32.xlu0 %v533_v62  ;;  %558 = vmax.xlane.f32.xlu1 %v557_v4 }
 0x2ca   :  { %552 = vmax.xlane.f32.xlu1 %v551_v10 }
 0x2d2   :  { %543 = vmax.xlane.f32.xlu1 %v542_v13 }
 0x315   :  { %v565_v17 = vpop.xlane.xlu0 %564 }
 0x316   :  { %v585_v20 = vsub.f32 %v517_v29, %v565_v17  ;;  %v524_v29 = vsel %vm203_vm0, %v1679_v6, -inf }
 0x318   :  { %v614_v21 = vmul.f32 1.442695, %v585_v20 }
 0x31a   :  { %1367 = vpow2.f32 %v614_v21 }
 0x31d   :  { %v568_v22 = vpop.xlane.xlu2 %567  ;;  %v556_v28 = vpop.xlane.xlu0 %555 }
 0x31e   :  { %v586_v23 = vsub.f32 %v520_v35, %v568_v22  ;;  %v582_v47 = vsub.f32 %v1698_v33, %v556_v28 }
 0x320   :  { %v1740_v24 = vpop.eup %1367  ;;  %v616_v26 = vmul.f32 1.442695, %v586_v23  ;;  %v608_v56 = vmul.f32 1.442695, %v582_v47 }
 0x321   :  { %v659_v7 = vsel %vm203_vm0, %v1740_v24, 0.0 }
 0x322   :  { %660 = vadd.xlane.f32.xlu0 %v659_v7  ;;  %1369 = vpow2.f32 %v616_v26 }
 0x325   :  { %v571_v19 = vpop.xlane.xlu1 %570  ;;  %v550_v36 = vpop.xlane.xlu0 %549 }
 0x326   :  { %v587_v27 = vsub.f32 %v522_v44, %v571_v19  ;;  %v580_v50 = vsub.f32 %v1708_v42, %v550_v36  ;;  %v547_v57 = vpop.xlane.xlu2 %546 }
 0x327   :  { %v579_v33 = vsub.f32 %v1706_v41, %v547_v57 }
 0x328   :  { %v618_v30 = vmul.f32 1.442695, %v587_v27  ;;  %v1744_v31 = vpop.eup %1369  ;;  %v604_v58 = vmul.f32 1.442695, %v580_v50 }
 0x329   :  { %v662_v32 = vsel %vm203_vm0, %v1744_v31, 0.0 }
 0x32a   :  { %525 = vmax.xlane.f32.xlu0 %v524_v29  ;;  %1371 = vpow2.f32 %v618_v30  ;;  %663 = vadd.xlane.f32.xlu2 %v662_v32 }
 0x32d   :  { %v562_v34 = vpop.xlane.xlu1 %561  ;;  %v541_v55 = vpop.xlane.xlu0 %540 }
 0x32e   :  { %v584_v37 = vsub.f32 %v515_v54, %v562_v34  ;;  %v530_v54 = vsel %vm203_vm0, %v1689_v16, -inf  ;;  %v577_v42 = vsub.f32 %v1718_v51, %v541_v55  ;;  %v538_v26 = vpop.xlane.xlu2 %537 }
 0x32f   :  { %v576_v30 = vsub.f32 %v1720_v52, %v538_v26 }
 0x330   :  { %v1750_v35 = vpop.eup %1371  ;;  %v612_v43 = vmul.f32 1.442695, %v584_v37  ;;  %v598_v21 = vmul.f32 1.442695, %v577_v42 }
 0x331   :  { %v665_v39 = vsel %vm203_vm0, %v1750_v35, 0.0  ;;  %v596_v36 = vmul.f32 1.442695, %v576_v30 }
 0x332   :  { %666 = vadd.xlane.f32.xlu1 %v665_v39  ;;  %528 = vmax.xlane.f32.xlu2 %v527_v40  ;;  %1373 = vpow2.f32 %v612_v43 }
 0x335   :  { %v559_v44 = vpop.xlane.xlu1 %558  ;;  %v535_v22 = vpop.xlane.xlu0 %534 }
 0x336   :  { %v583_v46 = vsub.f32 %v512_v60, %v559_v44  ;;  %v575_v27 = vsub.f32 %v1730_v59, %v535_v22 }
 0x338   :  { %v610_v49 = vmul.f32 1.442695, %v583_v46  ;;  %v1760_v10 = vpop.eup %1373  ;;  %v594_v34 = vmul.f32 1.442695, %v575_v27 }
 0x339   :  { %v656_v17 = vsel %vm203_vm0, %v1760_v10, 0.0 }
 0x33a   :  { %1375 = vpow2.f32 %v610_v49  ;;  %531 = vmax.xlane.f32.xlu1 %v530_v54 }
 0x33b   :  { %1377 = vpow2.f32 %v608_v56 }
 0x33c   :  { %1379 = vpow2.f32 %v604_v58 }
 0x33d   :  { %v553_v62 = vpop.xlane.xlu1 %552 }
 0x33e   :  { %v581_v4 = vsub.f32 %v507_v5, %v553_v62  ;;  %v602_v5 = vmul.f32 1.442695, %v579_v33 }
 0x340   :  { %v606_v60 = vmul.f32 1.442695, %v581_v4  ;;  %v1763_v13 = vpop.eup %1375 }
 0x341   :  { %v653_v20 = vsel %vm203_vm0, %v1763_v13, 0.0  ;;  %v1770_v41 = vpop.eup %1377 }
 0x342   :  { %1381 = vpow2.f32 %v606_v60  ;;  %657 = vadd.xlane.f32.xlu1 %v656_v17  ;;  %654 = vadd.xlane.f32.xlu2 %v653_v20  ;;  %v1773_v19 = vpop.eup %1379  ;;  %v650_v32 = vsel %vm203_vm0, %v1770_v41, 0.0 }
 0x343   :  { %1383 = vpow2.f32 %v602_v5 }
 0x344   :  { %1385 = vpow2.f32 %v598_v21 }
 0x345   :  { %v544_v23 = vpop.xlane.xlu1 %543 }
 0x346   :  { %v578_v7 = vsub.f32 %v1736_v12, %v544_v23  ;;  %v644_v12 = vsel %vm203_vm0, %v1773_v19, 0.0 }
 0x348   :  { %v1775_v51 = vpop.eup %1381  ;;  %v600_v28 = vmul.f32 1.442695, %v578_v7 }
 0x349   :  { %v647_v29 = vsel %vm203_vm0, %v1775_v51, 0.0  ;;  %v1785_v59 = vpop.eup %1383 }
 0x34a   :  { %1387 = vpow2.f32 %v600_v28  ;;  %648 = vadd.xlane.f32.xlu0 %v647_v29  ;;  %651 = vadd.xlane.f32.xlu1 %v650_v32  ;;  %v1787_v37 = vpop.eup %1385  ;;  %v641_v43 = vsel %vm203_vm0, %v1785_v59, 0.0 }
 0x34b   :  { %645 = vadd.xlane.f32.xlu2 %v644_v12  ;;  %1389 = vpow2.f32 %v594_v34  ;;  %v635_v40 = vsel %vm203_vm0, %v1787_v37, 0.0 }
 0x34c   :  { %1391 = vpow2.f32 %v596_v36 }
 0x350   :  { %v1789_v52 = vpop.eup %1387 }
 0x351   :  { %v638_v39 = vsel %vm203_vm0, %v1789_v52, 0.0  ;;  %v1797_v44 = vpop.eup %1389 }
 0x352   :  { %639 = vadd.xlane.f32.xlu0 %v638_v39  ;;  %642 = vadd.xlane.f32.xlu1 %v641_v43  ;;  %v1799_v46 = vpop.eup %1391  ;;  %v629_v47 = vsel %vm203_vm0, %v1797_v44, 0.0 }
 0x353   :  { %636 = vadd.xlane.f32.xlu2 %v635_v40  ;;  %v632_v49 = vsel %vm203_vm0, %v1799_v46, 0.0 }
 0x35a   :  { %630 = vadd.xlane.f32.xlu0 %v629_v47  ;;  %633 = vadd.xlane.f32.xlu1 %v632_v49 }
 0x395   :  { %v661_v50 = vpop.xlane.xlu0 %660 }
 0x39d   :  { %v526_v54 = vpop.xlane.xlu0 %525  ;;  %v664_v56 = vpop.xlane.xlu2 %663 }
 0x39e   :  { %v572_v55 = vsub.f32 %v1679_v6, %v526_v54 }
 0x3a0   :  { %v588_v57 = vmul.f32 1.442695, %v572_v55 }
 0x3a2   :  { %1393 = vpow2.f32 %v588_v57 }
 0x3a5   :  { %v667_v58 = vpop.xlane.xlu1 %666  ;;  %v529_v62 = vpop.xlane.xlu2 %528 }
 0x3a6   :  { %1395 = vrcp.f32 %v667_v58  ;;  %v573_v4 = vsub.f32 %v1684_v11, %v529_v62 }
 0x3a7   :  { %1397 = vrcp.f32 %v664_v56 }
 0x3a8   :  { %v1807_v33 = vpop.eup %1393  ;;  %v590_v60 = vmul.f32 1.442695, %v573_v4 }
 0x3a9   :  { %v620_v42 = vsel %vm203_vm0, %v1807_v33, 0.0 }
 0x3aa   :  { %621 = vadd.xlane.f32.xlu0 %v620_v42  ;;  %1399 = vpow2.f32 %v590_v60  ;;  %v68_v42 = vld [vmem:[%s2059_s2 + $0x18] sm:$0xff] }
 0x3ab   :  { %1401 = vrcp.f32 %v661_v50 }
 0x3ac   :  { %v1396_v17 = vpop.eup %1395 }
 0x3ad   :  { %v532_v6 = vpop.xlane.xlu1 %531  ;;  %v699_v20 = vmul.f32 %v1396_v17, %v1750_v35  ;;  %v1398_v5 = vpop.eup %1397 }
 0x3ae   :  { %v574_v21 = vsub.f32 %v1689_v16, %v532_v6  ;;  %v698_v26 = vmul.f32 %v1398_v5, %v1744_v31  ;;  %v475_v6 = vsel %vm377_vm1, %v1660_v38, 0 }
 0x3af   :  { %1296 = vmatpush.xpose.msk.msrb.mxu0 %vm203_vm0, %v699_v20 }
 0x3b0   :  { %v1814_v11 = vpop.eup %1399  ;;  %v592_v22 = vmul.f32 1.442695, %v574_v21  ;;  %v65_v21 = vld [vmem:[%s2059_s2] sm:$0xff] }
 0x3b1   :  { %v623_v23 = vsel %vm203_vm0, %v1814_v11, 0.0  ;;  %v1402_v7 = vpop.eup %1401 }
 0x3b2   :  { %1403 = vpow2.f32 %v592_v22  ;;  %624 = vadd.xlane.f32.xlu1 %v623_v23  ;;  %v697_v28 = vmul.f32 %v1402_v7, %v1740_v24  ;;  %v66_v22 = vld [vmem:[%s2059_s2 + $0x8] sm:$0xff] }
 0x3b3   :  { %1297 = vmatpush.xpose.msk.msrb.mxu0 %vm203_vm0, %v698_v26 }
 0x3b5   :  { %v658_v27 = vpop.xlane.xlu1 %657  ;;  %v655_v35 = vpop.xlane.xlu2 %654 }
 0x3b6   :  { %1405 = vrcp.f32 %v658_v27 }
 0x3b7   :  { %1298 = vmatpush.xpose.msk.msrb.mxu0 %vm203_vm0, %v697_v28  ;;  %1407 = vrcp.f32 %v655_v35 }
 0x3b8   :  { %v1822_v16 = vpop.eup %1403 }
 0x3b9   :  { %v626_v30 = vsel %vm203_vm0, %v1822_v16, 0.0 }
 0x3ba   :  { %627 = vadd.xlane.f32.xlu2 %v626_v30 }
 0x3bc   :  { %v1406_v31 = vpop.eup %1405 }
 0x3bd   :  { %v649_v29 = vpop.xlane.xlu0 %648  ;;  %v652_v32 = vpop.xlane.xlu1 %651  ;;  %v696_v12 = vmul.f32 %v1406_v31, %v1760_v10 }
 0x3be   :  { %v1408_v34 = vpop.eup %1407  ;;  %1409 = vrcp.f32 %v652_v32  ;;  %v646_v36 = vpop.xlane.xlu2 %645 }
 0x3bf   :  { %1299 = vmatpush.xpose.msk.msrb.mxu0 %vm203_vm0, %v696_v12  ;;  %1411 = vrcp.f32 %v649_v29  ;;  %v695_v24 = vmul.f32 %v1408_v34, %v1763_v13  ;;  %v98_v12 = vld [vmem:[%s2060_s8 + $0x18] sm:$0xff] }
 0x3c0   :  { %1413 = vrcp.f32 %v646_v36  ;;  %v102_v34 = vld [vmem:[%s2060_s8 + $0x38] sm:$0xff] }
 0x3c3   :  { %1300 = vmatpush.xpose.msk.msrb.mxu0 %vm203_vm0, %v695_v24 }
 0x3c4   :  { %v1410_v39 = vpop.eup %1409 }
 0x3c5   :  { %v640_v40 = vpop.xlane.xlu0 %639  ;;  %v643_v43 = vpop.xlane.xlu1 %642  ;;  %v694_v47 = vmul.f32 %v1410_v39, %v1770_v41  ;;  %v481_v41 = vsel %vm377_vm1, %v1672_v63, 0  ;;  %v478_v63 = vsel %vm377_vm1, %v1668_v53, 0  ;;  %v472_v53 = vsel %vm377_vm1, %v1646_v18, 0 }
 0x3c6   :  { %v1412_v49 = vpop.eup %1411  ;;  %1415 = vrcp.f32 %v643_v43  ;;  %v637_v10 = vpop.xlane.xlu2 %636 }
 0x3c7   :  { %1301 = vmatpush.xpose.msk.msrb.mxu0 %vm203_vm0, %v694_v47  ;;  %1417 = vrcp.f32 %v640_v40  ;;  %v693_v50 = vmul.f32 %v1412_v49, %v1775_v51  ;;  %v1414_v54 = vpop.eup %1413  ;;  %v67_v51 = vld [vmem:[%s2059_s2 + $0x10] sm:$0xff]  ;;  %v95_v47 = vld [vmem:[%s2060_s8] sm:$0xff] }
 0x3c8   :  { %1419 = vrcp.f32 %v637_v10  ;;  %v692_v57 = vmul.f32 %v1414_v54, %v1773_v19  ;;  %v99_v49 = vld [vmem:[%s2060_s8 + $0x20] sm:$0xff] }
 0x3cb   :  { %1302 = vmatpush.xpose.msk.msrb.mxu0 %vm203_vm0, %v693_v50 }
 0x3cc   :  { %v1416_v13 = vpop.eup %1415 }
 0x3cd   :  { %v634_v55 = vpop.xlane.xlu1 %633  ;;  %v691_v56 = vmul.f32 %v1416_v13, %v1785_v59  ;;  %v1418_v58 = vpop.eup %1417 }
 0x3ce   :  { %1421 = vrcp.f32 %v634_v55  ;;  %v631_v62 = vpop.xlane.xlu0 %630  ;;  %v690_v4 = vmul.f32 %v1418_v58, %v1789_v52  ;;  %v1420_v59 = vpop.eup %1419  ;;  %v96_v55 = vld [vmem:[%s2060_s8 + $0x8] sm:$0xff] }
 0x3cf   :  { %1286 = vmatpush.xpose.msk.msra.mxu3 %vm203_vm0, %v691_v56  ;;  %1303 = vmatpush.xpose.msk.msrb.mxu0 %vm203_vm0, %v692_v57  ;;  %1423 = vrcp.f32 %v631_v62  ;;  %v689_v19 = vmul.f32 %v1420_v59, %v1787_v37 }
 0x3d2   :  { %1304 = vmatmul.msk.f32.vlgmr.msrb.gmra.mxu0 %vm203_vm0, %v67_v51 }
 0x3d3   :  { %867 = vmatpush.bf16.xpose.msra.mxu0 %v481_v41  ;;  %1287 = vmatpush.xpose.msk.msra.mxu3 %vm203_vm0, %v690_v4 }
 0x3d4   :  { %v1422_v60 = vpop.eup %1421 }
 0x3d5   :  { %v688_v52 = vmul.f32 %v1422_v60, %v1799_v46  ;;  %v1424_v17 = vpop.eup %1423 }
 0x3d6   :  { %v687_v37 = vmul.f32 %v1424_v17, %v1797_v44 }
 0x3d7   :  { %1288 = vmatpush.xpose.msk.msra.mxu3 %vm203_vm0, %v689_v19 }
 0x3da   :  { %1305 = vmatmul.msk.f32.gmra.mxu0 %vm203_vm0, %v68_v42 }
 0x3db   :  { %868 = vmatpush.bf16.xpose.msra.mxu0 %v478_v63  ;;  %1289 = vmatpush.xpose.msk.msra.mxu3 %vm203_vm0, %v688_v52 }
 0x3df   :  { %1290 = vmatpush.xpose.msk.msra.mxu3 %vm203_vm0, %v687_v37 }
 0x3e3   :  { %869 = vmatpush.bf16.xpose.msra.mxu0 %v475_v6 }
 0x3eb   :  { %870 = vmatpush.bf16.xpose.msra.mxu0 %v472_v53 }
 0x3f2   :  { %1310 = vmatmul.msk.bf16.vlgmr.msra.gmra.mxu0 %vm377_vm1, %v1530_v1 }
 0x402   :  { %1311 = vmatmul.msk.bf16.gmra.mxu0 %vm377_vm1, %v1542_v3 }
 0x412   :  { %1312 = vmatmul.msk.bf16.gmra.mxu0 %vm377_vm1, %v1562_v9 }
 0x41d   :  { %v622_v38 = vpop.xlane.xlu0 %621 }
 0x422   :  { %1313 = vmatmul.msk.bf16.gmra.mxu0 %vm377_vm1, %v1582_v15  ;;  %v388_v15 = vsel %vm377_vm1, %v1664_v45, 0  ;;  %v382_v45 = vsel %vm377_vm1, %v1636_v61, 0 }
 0x425   :  { %v625_v44 = vpop.xlane.xlu1 %624 }
 0x42d   :  { %v628_v46 = vpop.xlane.xlu2 %627 }
 0x42e   :  { %1425 = vrcp.f32 %v628_v46 }
 0x42f   :  { %1427 = vrcp.f32 %v625_v44 }
 0x430   :  { %1429 = vrcp.f32 %v622_v38 }
 0x434   :  { %v1426_v20 = vpop.eup %1425 }
 0x435   :  { %v686_v18 = vmul.f32 %v1426_v20, %v1822_v16  ;;  %v1428_v5 = vpop.eup %1427  ;;  %v97_v16 = vld [vmem:[%s2060_s8 + $0x10] sm:$0xff] }
 0x436   :  { %v685_v1 = vmul.f32 %v1428_v5, %v1814_v11  ;;  %v1430_v3 = vpop.eup %1429  ;;  %v385_v11 = vsel %vm377_vm1, %v1650_v25, 0 }
 0x437   :  { %1291 = vmatpush.xpose.msk.msra.mxu3 %vm203_vm0, %v686_v18  ;;  %v684_v9 = vmul.f32 %v1430_v3, %v1807_v33  ;;  %v379_v33 = vsel %vm377_vm1, %v1626_v48, 0 }
 0x43b   :  { %1292 = vmatpush.xpose.msk.msra.mxu3 %vm203_vm0, %v685_v1 }
 0x43f   :  { %1293 = vmatpush.xpose.msk.msra.mxu3 %vm203_vm0, %v684_v9 }
 0x442   :  { %1294 = vmatmul.msk.f32.vlgmr.msra.gmra.mxu3 %vm203_vm0, %v65_v21 }
 0x443   :  { %826 = vmatpush.bf16.xpose.msrb.mxu3 %v388_v15 }
 0x44a   :  { %1295 = vmatmul.msk.f32.gmra.mxu3 %vm203_vm0, %v66_v22 }
 0x44b   :  { %827 = vmatpush.bf16.xpose.msrb.mxu3 %v385_v11 }
 0x44f   :  { %v1892_v23 = vpop.f32.mrf.mxu0 }
 0x453   :  { %828 = vmatpush.bf16.xpose.msrb.mxu3 %v382_v45 }
 0x457   :  { %v1896_v25 = vpop.f32.mrf.mxu0 }
 0x45b   :  { %829 = vmatpush.bf16.xpose.msrb.mxu3 %v379_v33 }
 0x462   :  { %1306 = vmatmul.msk.bf16.vlgmr.msrb.gmra.mxu3 %vm377_vm1, %v1525_v0  ;;  %v100_v0 = vld [vmem:[%s2060_s8 + $0x28] sm:$0xff] }
 0x46f   :  { %v872_v26 = vpop.f32.mrf.mxu0 }
 0x470   :  { %v1939_v10 = vadd.f32 %v872_v26, %v95_v47 }
 0x472   :  { %1307 = vmatmul.msk.bf16.gmra.mxu3 %vm377_vm1, %v1537_v2  ;;  %v916_v13 = vsel %vm203_vm0, %v1939_v10, -inf }
 0x477   :  { %v874_v7 = vpop.f32.mrf.mxu0 }
 0x478   :  { %v1947_v56 = vadd.f32 %v874_v7, %v96_v55 }
 0x47a   :  { %v919_v57 = vsel %vm203_vm0, %v1947_v56, -inf }
 0x47f   :  { %v877_v27 = vpop.f32.mrf.mxu0 }
 0x482   :  { %1308 = vmatmul.msk.bf16.gmra.mxu3 %vm377_vm1, %v1557_v8  ;;  %v101_v8 = vld [vmem:[%s2060_s8 + $0x30] sm:$0xff] }
 0x487   :  { %v879_v61 = vpop.f32.mrf.mxu0 }
 0x488   :  { %v1928_v36 = vadd.f32 %v879_v61, %v98_v12 }
 0x48a   :  { %v925_v43 = vsel %vm203_vm0, %v1928_v36, -inf }
 0x48f   :  { %v882_v35 = vpop.f32.mrf.mxu0 }
 0x490   :  { %v883_v50 = vadd.f32 %v882_v35, %v99_v49 }
 0x492   :  { %1309 = vmatmul.msk.bf16.gmra.mxu3 %vm377_vm1, %v1577_v14  ;;  %v1917_v14 = vadd.f32 %v877_v27, %v97_v16  ;;  %v928_v54 = vsel %vm203_vm0, %v883_v50, -inf }
 0x494   :  { %v922_v32 = vsel %vm203_vm0, %v1917_v14, -inf }
 0x497   :  { %v884_v48 = vpop.f32.mrf.mxu0 }
 0x498   :  { %v1907_v28 = vadd.f32 %v884_v48, %v100_v0 }
 0x49a   :  { %v931_v2 = vsel %vm203_vm0, %v1907_v28, -inf }
 0x49b   :  { %932 = vmax.xlane.f32.xlu0 %v931_v2 }
 0x49f   :  { %v887_v30 = vpop.f32.mrf.mxu0 }
 0x4a0   :  { %v888_v31 = vadd.f32 %v887_v30, %v101_v8 }
 0x4a2   :  { %v934_v29 = vsel %vm203_vm0, %v888_v31, -inf }
 0x4a3   :  { %935 = vmax.xlane.f32.xlu1 %v934_v29  ;;  %923 = vmax.xlane.f32.xlu0 %v922_v32 }
 0x4a7   :  { %v889_v24 = vpop.f32.mrf.mxu0 }
 0x4a8   :  { %v890_v39 = vadd.f32 %v889_v24, %v102_v34 }
 0x4aa   :  { %v937_v40 = vsel %vm203_vm0, %v890_v39, -inf }
 0x4ab   :  { %938 = vmax.xlane.f32.xlu2 %v937_v40  ;;  %926 = vmax.xlane.f32.xlu1 %v925_v43 }
 0x4b3   :  { %929 = vmax.xlane.f32.xlu2 %v928_v54  ;;  %917 = vmax.xlane.f32.xlu1 %v916_v13  ;;  %v2002_v13 = vld [vmem:[%s2061_s6] sm:$0xff] }
 0x4bb   :  { %920 = vmax.xlane.f32.xlu2 %v919_v57 }
 0x4c5   :  { %v1951_v58 = vpop.f32.mrf.mxu3 }
 0x4cd   :  { %v1953_v41 = vpop.f32.mrf.mxu3 }
 0x4e5   :  { %v831_v51 = vpop.f32.mrf.mxu3 }
 0x4e6   :  { %v1976_v45 = vadd.f32 %v831_v51, %v95_v47 }
 0x4ed   :  { %v833_v62 = vpop.f32.mrf.mxu3 }
 0x4f5   :  { %v836_v4 = vpop.f32.mrf.mxu3 }
 0x4f6   :  { %v1959_v52 = vadd.f32 %v836_v4, %v97_v16  ;;  %v1986_v16 = vadd.f32 %v833_v62, %v96_v55 }
 0x4f8   :  { %v898_v53 = vsel %vm203_vm0, %v1959_v52, -inf }
 0x4fd   :  { %v838_v59 = vpop.f32.mrf.mxu3 }
 0x4fe   :  { %v1967_v44 = vadd.f32 %v838_v59, %v98_v12  ;;  %v895_v12 = vsel %vm203_vm0, %v1986_v16, -inf }
 0x500   :  { %v901_v15 = vsel %vm203_vm0, %v1967_v44, -inf }
 0x505   :  { %v841_v19 = vpop.f32.mrf.mxu3 }
 0x506   :  { %v1978_v33 = vadd.f32 %v841_v19, %v99_v49 }
 0x508   :  { %v904_v35 = vsel %vm203_vm0, %v1978_v33, -inf }
 0x50d   :  { %v843_v60 = vpop.f32.mrf.mxu3 }
 0x50e   :  { %v1955_v63 = vadd.f32 %v843_v60, %v100_v0  ;;  %v933_v3 = vpop.xlane.xlu0 %932  ;;  %v892_v0 = vsel %vm203_vm0, %v1976_v45, -inf }
 0x50f   :  { %v953_v11 = vsub.f32 %v1907_v28, %v933_v3 }
 0x510   :  { %v907_v42 = vsel %vm203_vm0, %v1955_v63, -inf }
 0x511   :  { %908 = vmax.xlane.f32.xlu1 %v907_v42  ;;  %v982_v7 = vmul.f32 1.442695, %v953_v11 }
 0x515   :  { %v846_v17 = vpop.f32.mrf.mxu3 }
 0x516   :  { %v1961_v37 = vadd.f32 %v846_v17, %v101_v8  ;;  %v936_v46 = vpop.xlane.xlu1 %935  ;;  %v924_v8 = vpop.xlane.xlu0 %923 }
 0x517   :  { %v954_v5 = vsub.f32 %v888_v31, %v936_v46  ;;  %v950_v31 = vsub.f32 %v1917_v14, %v924_v8 }
 0x518   :  { %v910_v6 = vsel %vm203_vm0, %v1961_v37, -inf }
 0x519   :  { %911 = vmax.xlane.f32.xlu2 %v910_v6  ;;  %899 = vmax.xlane.f32.xlu1 %v898_v53  ;;  %v984_v22 = vmul.f32 1.442695, %v954_v5 }
 0x51d   :  { %v848_v38 = vpop.f32.mrf.mxu3 }
 0x51e   :  { %v1969_v20 = vadd.f32 %v848_v38, %v102_v34  ;;  %v939_v18 = vpop.xlane.xlu2 %938  ;;  %v927_v61 = vpop.xlane.xlu1 %926 }
 0x51f   :  { %v955_v1 = vsub.f32 %v890_v39, %v939_v18  ;;  %v951_v28 = vsub.f32 %v1928_v36, %v927_v61  ;;  %v976_v36 = vmul.f32 1.442695, %v950_v31  ;;  %v806_v61 = vmul.f32 %v1951_v58, %v2002_v13 }
 0x520   :  { %v913_v9 = vsel %vm203_vm0, %v1969_v20, -inf }
 0x521   :  { %v986_v21 = vmul.f32 1.442695, %v955_v1  ;;  %914 = vmax.xlane.f32.xlu0 %v913_v9  ;;  %902 = vmax.xlane.f32.xlu2 %v901_v15  ;;  %v978_v29 = vmul.f32 1.442695, %v951_v28 }
 0x523   :  { %1431 = vpow2.f32 %v986_v21 }
 0x524   :  { %1433 = vpow2.f32 %v984_v22 }
 0x525   :  { %1435 = vpow2.f32 %v982_v7 }
 0x526   :  { %v930_v26 = vpop.xlane.xlu2 %929  ;;  %v918_v39 = vpop.xlane.xlu1 %917 }
 0x527   :  { %v952_v27 = vsub.f32 %v883_v50, %v930_v26  ;;  %v948_v14 = vsub.f32 %v1939_v10, %v918_v39  ;;  %v808_v10 = vmul.f32 %v1892_v23, %v2002_v13 }
 0x529   :  { %v1432_v48 = vpop.eup %1431  ;;  %905 = vmax.xlane.f32.xlu0 %v904_v35  ;;  %893 = vmax.xlane.f32.xlu2 %v892_v0  ;;  %v980_v2 = vmul.f32 1.442695, %v952_v27  ;;  %v972_v49 = vmul.f32 1.442695, %v948_v14 }
 0x52a   :  { %1326 = vmatpush.xpose.msk.msrb.mxu2 %vm203_vm0, %v1432_v48  ;;  %v1434_v30 = vpop.eup %1433 }
 0x52b   :  { %1437 = vpow2.f32 %v980_v2  ;;  %v1436_v34 = vpop.eup %1435 }
 0x52c   :  { %1439 = vpow2.f32 %v978_v29 }
 0x52d   :  { %1441 = vpow2.f32 %v976_v36 }
 0x52e   :  { %1327 = vmatpush.xpose.msk.msrb.mxu2 %vm203_vm0, %v1434_v30  ;;  %v921_v32 = vpop.xlane.xlu2 %920 }
 0x52f   :  { %v949_v24 = vsub.f32 %v1947_v56, %v921_v32  ;;  %v86_v56 = vld [vmem:[%s2061_s6 + $0x8] sm:$0xff]  ;;  %s1471_s6 = smov 64  }
 0x530   :  { %v809_v57 = vmul.f32 %v1896_v25, %v86_v56 }
 0x531   :  { %896 = vmax.xlane.f32.xlu0 %v895_v12  ;;  %v1438_v40 = vpop.eup %1437  ;;  %v974_v43 = vmul.f32 1.442695, %v949_v24 }
 0x532   :  { %1328 = vmatpush.xpose.msk.msrb.mxu2 %vm203_vm0, %v1436_v34  ;;  %v1440_v47 = vpop.eup %1439 }
 0x533   :  { %1443 = vpow2.f32 %v974_v43  ;;  %v1442_v50 = vpop.eup %1441 }
 0x534   :  { %1445 = vpow2.f32 %v972_v49 }
 0x536   :  { %1329 = vmatpush.xpose.msk.msrb.mxu2 %vm203_vm0, %v1438_v40 }
 0x539   :  { %v1444_v54 = vpop.eup %1443 }
 0x53a   :  { %1330 = vmatpush.xpose.msk.msrb.mxu2 %vm203_vm0, %v1440_v47  ;;  %v1446_v55 = vpop.eup %1445 }
 0x53e   :  { %1331 = vmatpush.xpose.msk.msrb.mxu2 %vm203_vm0, %v1442_v50 }
 0x542   :  { %1332 = vmatpush.xpose.msk.msrb.mxu2 %vm203_vm0, %v1444_v54 }
 0x546   :  { %1333 = vmatpush.xpose.msk.msrb.mxu2 %vm203_vm0, %v1446_v55 }
 0x549   :  { %1334 = vmatmul.msk.f32.vlgmr.msrb.gmra.mxu2 %vm203_vm0, %v808_v10 }
 0x551   :  { %1335 = vmatmul.msk.f32.gmra.mxu2 %vm203_vm0, %v809_v57 }
 0x559   :  { %1336 = vmatmul.msk.f32.gmra.mxu2 %vm203_vm0, %v2002_v13 }
 0x561   :  { %1337 = vmatmul.msk.f32.gmra.mxu2 %vm203_vm0, %v86_v56 }
 0x584   :  { %v909_v59 = vpop.xlane.xlu1 %908 }
 0x585   :  { %v945_v60 = vsub.f32 %v1955_v63, %v909_v59 }
 0x587   :  { %v966_v17 = vmul.f32 1.442695, %v945_v60 }
 0x58c   :  { %v912_v51 = vpop.xlane.xlu2 %911 }
 0x58d   :  { %v946_v4 = vsub.f32 %v1961_v37, %v912_v51 }
 0x58f   :  { %v968_v42 = vmul.f32 1.442695, %v946_v4 }
 0x594   :  { %v915_v62 = vpop.xlane.xlu0 %914  ;;  %v903_v53 = vpop.xlane.xlu2 %902 }
 0x595   :  { %v947_v23 = vsub.f32 %v1969_v20, %v915_v62  ;;  %v943_v37 = vsub.f32 %v1967_v44, %v903_v53  ;;  %v900_v20 = vpop.xlane.xlu1 %899 }
 0x596   :  { %v942_v63 = vsub.f32 %v1959_v52, %v900_v20 }
 0x597   :  { %v970_v19 = vmul.f32 1.442695, %v947_v23  ;;  %v962_v5 = vmul.f32 1.442695, %v943_v37 }
 0x598   :  { %v960_v9 = vmul.f32 1.442695, %v942_v63 }
 0x599   :  { %1447 = vpow2.f32 %v970_v19 }
 0x59a   :  { %1449 = vpow2.f32 %v968_v42 }
 0x59b   :  { %1451 = vpow2.f32 %v966_v17 }
 0x59c   :  { %v906_v25 = vpop.xlane.xlu0 %905  ;;  %v894_v21 = vpop.xlane.xlu2 %893 }
 0x59d   :  { %v944_v6 = vsub.f32 %v1978_v33, %v906_v25  ;;  %v940_v44 = vsub.f32 %v1976_v45, %v894_v21  ;;  %v807_v45 = vmul.f32 %v1953_v41, %v86_v56 }
 0x59f   :  { %v1448_v46 = vpop.eup %1447  ;;  %v964_v38 = vmul.f32 1.442695, %v944_v6  ;;  %v956_v52 = vmul.f32 1.442695, %v940_v44 }
 0x5a0   :  { %1314 = vmatpush.xpose.msk.msrb.mxu1 %vm203_vm0, %v1448_v46  ;;  %v1450_v18 = vpop.eup %1449 }
 0x5a1   :  { %1453 = vpow2.f32 %v964_v38  ;;  %v1452_v3 = vpop.eup %1451 }
 0x5a2   :  { %1455 = vpow2.f32 %v962_v5 }
 0x5a3   :  { %1457 = vpow2.f32 %v960_v9 }
 0x5a4   :  { %1315 = vmatpush.xpose.msk.msrb.mxu1 %vm203_vm0, %v1450_v18  ;;  %v897_v1 = vpop.xlane.xlu0 %896 }
 0x5a5   :  { %v941_v15 = vsub.f32 %v1986_v16, %v897_v1 }
 0x5a7   :  { %v1454_v11 = vpop.eup %1453  ;;  %v958_v22 = vmul.f32 1.442695, %v941_v15 }
 0x5a8   :  { %1316 = vmatpush.xpose.msk.msrb.mxu1 %vm203_vm0, %v1452_v3  ;;  %v1456_v33 = vpop.eup %1455  ;;  %v1186_v3 = vld [vmem:[%s2062_s3] sm:$0xff] }
 0x5a9   :  { %1459 = vpow2.f32 %v958_v22  ;;  %v1458_v26 = vpop.eup %1457 }
 0x5aa   :  { %1461 = vpow2.f32 %v956_v52 }
 0x5ac   :  { %1317 = vmatpush.xpose.msk.msrb.mxu1 %vm203_vm0, %v1454_v11 }
 0x5af   :  { %v1460_v7 = vpop.eup %1459 }
 0x5b0   :  { %1318 = vmatpush.xpose.msk.msrb.mxu1 %vm203_vm0, %v1456_v33  ;;  %v1462_v27 = vpop.eup %1461 }
 0x5b4   :  { %1319 = vmatpush.xpose.msk.msrb.mxu1 %vm203_vm0, %v1458_v26  ;;  %v1187_v26 = vld [vmem:[%s2062_s3 + $0x8] sm:$0xff] }
 0x5b8   :  { %1320 = vmatpush.xpose.msk.msrb.mxu1 %vm203_vm0, %v1460_v7 }
 0x5bc   :  { %1321 = vmatpush.xpose.msk.msrb.mxu1 %vm203_vm0, %v1462_v27 }
 0x5bf   :  { %1322 = vmatmul.msk.f32.vlgmr.msrb.gmra.mxu1 %vm203_vm0, %v806_v61 }
 0x5c7   :  { %1323 = vmatmul.msk.f32.gmra.mxu1 %vm203_vm0, %v807_v45 }
 0x5cc   :  { %v1100_v35 = vpop.f32.mrf.mxu2 }
 0x5cf   :  { %1324 = vmatmul.msk.f32.gmra.mxu1 %vm203_vm0, %v2002_v13 }
 0x5d4   :  { %v1103_v0 = vpop.f32.mrf.mxu2 }
 0x5d7   :  { %1325 = vmatmul.msk.f32.gmra.mxu1 %vm203_vm0, %v86_v56 }
 0x5dc   :  { %v1106_v48 = vpop.f32.mrf.mxu2 }
 0x5dd   :  { %v1114_v28 = vmax.f32 %v1106_v48, 1e-30 }
 0x5df   :  { %1463 = vrcp.f32 %v1114_v28  ;;  %v1157_v31 = vand.u32 2147483648, %v1114_v28  ;;  %v1155_v29 = vand.u32 2147483647, %v1114_v28  ;;  %vm1151_vm3 = vweird.f32 %v1114_v28 }
 0x5e1   :  { %v1158_v34 = vor.u32 1.1754944e-38, %v1157_v31  ;;  %vm1156_vm5 = vcmp.eq.f32.partialorder %v1155_v29, 8.507059e+37 }
 0x5e4   :  { %v1109_v2 = vpop.f32.mrf.mxu2 }
 0x5e5   :  { %v1464_v16 = vpop.eup %1463  ;;  %v1115_v8 = vmax.f32 %v1109_v2, 1e-30 }
 0x5e6   :  { %v1147_v58 = vmul.f32 %v1464_v16, %v1114_v28  ;;  %vm1152_vm2 = vweird.f32 %v1464_v16 }
 0x5e7   :  { %1465 = vrcp.f32 %v1115_v8  ;;  %vm1153_vm4 = vmor %vm1151_vm3, %vm1152_vm2  ;;  %v1172_v43 = vand.u32 2147483648, %v1115_v8  ;;  %v1170_v49 = vand.u32 2147483647, %v1115_v8  ;;  %vm1166_vm7 = vweird.f32 %v1115_v8 }
 0x5e8   :  { %v1148_v30 = vsub.f32 1.0, %v1147_v58 }
 0x5e9   :  { %v1173_v54 = vor.u32 1.1754944e-38, %v1172_v43  ;;  %vm1171_vm9 = vcmp.eq.f32.partialorder %v1170_v49, 8.507059e+37 }
 0x5ea   :  { %v1149_v41 = vmul.f32 %v1464_v16, %v1148_v30 }
 0x5ec   :  { %v1150_v32 = vadd.f32 %v1464_v16, %v1149_v41 }
 0x5ed   :  { %v1466_v12 = vpop.eup %1465 }
 0x5ee   :  { %v1162_v36 = vmul.f32 %v1466_v12, %v1115_v8  ;;  %v1154_v24 = vsel %vm1153_vm4, %v1464_v16, %v1150_v32  ;;  %vm1167_vm6 = vweird.f32 %v1466_v12 }
 0x5ef   :  { %v1159_v39 = vsel %vm1156_vm5, %v1158_v34, %v1154_v24  ;;  %vm1168_vm8 = vmor %vm1166_vm7, %vm1167_vm6 }
 0x5f0   :  { %v1163_v40 = vsub.f32 1.0, %v1162_v36  ;;  %v1160_v14 = vmul.f32 %v1159_v39, %v1100_v35 }
 0x5f2   :  { %1178 = vrot.lane.b32.xlu1 %v1160_v14, %s1471_s6  ;;  %v1164_v47 = vmul.f32 %v1466_v12, %v1163_v40 }
 0x5f4   :  { %v1165_v50 = vadd.f32 %v1466_v12, %v1164_v47 }
 0x5f6   :  { %v1169_v13 = vsel %vm1168_vm8, %v1466_v12, %v1165_v50 }
 0x5f7   :  { %v1174_v55 = vsel %vm1171_vm9, %v1173_v54, %v1169_v13 }
 0x5f8   :  { %v1175_v10 = vmul.f32 %v1174_v55, %v1103_v0 }
 0x5fa   :  { %1180 = vrot.lane.b32.xlu0 %v1175_v10, %s1471_s6 }
 0x63c   :  { %v1041_v56 = vpop.f32.mrf.mxu1 }
 0x644   :  { %v1044_v57 = vpop.f32.mrf.mxu1 }
 0x64c   :  { %v1047_v51 = vpop.f32.mrf.mxu1 }
 0x64d   :  { %v1112_v62 = vmax.f32 %v1047_v51, 1e-30 }
 0x64f   :  { %1467 = vrcp.f32 %v1112_v62  ;;  %v1127_v25 = vand.u32 2147483648, %v1112_v62  ;;  %v1125_v17 = vand.u32 2147483647, %v1112_v62  ;;  %vm1121_vm11 = vweird.f32 %v1112_v62 }
 0x651   :  { %v1128_v38 = vor.u32 1.1754944e-38, %v1127_v25  ;;  %vm1126_vm13 = vcmp.eq.f32.partialorder %v1125_v17, 8.507059e+37 }
 0x654   :  { %v1050_v4 = vpop.f32.mrf.mxu1 }
 0x655   :  { %v1468_v23 = vpop.eup %1467  ;;  %v1113_v59 = vmax.f32 %v1050_v4, 1e-30 }
 0x656   :  { %v1117_v19 = vmul.f32 %v1468_v23, %v1112_v62  ;;  %vm1122_vm10 = vweird.f32 %v1468_v23 }
 0x657   :  { %1469 = vrcp.f32 %v1113_v59  ;;  %vm1123_vm12 = vmor %vm1121_vm11, %vm1122_vm10  ;;  %v1142_v5 = vand.u32 2147483648, %v1113_v59  ;;  %v1140_v9 = vand.u32 2147483647, %v1113_v59  ;;  %vm1136_vm15 = vweird.f32 %v1113_v59 }
 0x658   :  { %v1118_v60 = vsub.f32 1.0, %v1117_v19 }
 0x659   :  { %v1143_v33 = vor.u32 1.1754944e-38, %v1142_v5  ;;  %vm1141_vm2 = vcmp.eq.f32.partialorder %v1140_v9, 8.507059e+37 }
 0x65a   :  { %v1119_v42 = vmul.f32 %v1468_v23, %v1118_v60 }
 0x65c   :  { %v1120_v6 = vadd.f32 %v1468_v23, %v1119_v42 }
 0x65d   :  { %v1470_v53 = vpop.eup %1469 }
 0x65e   :  { %v1132_v46 = vmul.f32 %v1470_v53, %v1113_v59  ;;  %v1124_v37 = vsel %vm1123_vm12, %v1468_v23, %v1120_v6  ;;  %vm1137_vm14 = vweird.f32 %v1470_v53 }
 0x65f   :  { %v1129_v18 = vsel %vm1126_vm13, %v1128_v38, %v1124_v37  ;;  %vm1138_vm1 = vmor %vm1136_vm15, %vm1137_vm14 }
 0x660   :  { %v1133_v20 = vsub.f32 1.0, %v1132_v46  ;;  %v1130_v1 = vmul.f32 %v1129_v18, %v1041_v56 }
 0x662   :  { %v1134_v63 = vmul.f32 %v1470_v53, %v1133_v20 }
 0x664   :  { %v1179_v15 = vpop.permute.xlu1 %1178  ;;  %v1135_v21 = vadd.f32 %v1470_v53, %v1134_v63 }
 0x665   :  { %v1184_v11 = vsel %vm203_vm0, %v1130_v1, %v1179_v15 }
 0x666   :  { %v1188_v44 = vadd.f32 %v1186_v3, %v1184_v11  ;;  %v1139_v22 = vsel %vm1138_vm1, %v1470_v53, %v1135_v21 }
 0x667   :  { %v1144_v52 = vsel %vm1141_vm2, %v1143_v33, %v1139_v22 }
 0x668   :  { %1190 = vst [vmem:[%s2063_s9] sm:$0xff] %v1188_v44  ;;  %v1145_v7 = vmul.f32 %v1144_v52, %v1044_v57 }
 0x66c   :  { %v1181_v27 = vpop.permute.xlu0 %1180 }
 0x66d   :  { %v1185_v61 = vsel %vm203_vm0, %v1145_v7, %v1181_v27 }
 0x66e   :  { %v1189_v45 = vadd.f32 %v1187_v26, %v1185_v61 }
 0x670   :  { %1191 = vst [vmem:[%s2063_s9 + $0x8] sm:$0xff] %v1189_v45 }

</bundles_post_ra>
